<compile_context>
chip_gen: v6e
topology: v6e:2x2x1
jax: 0.10.0
libtpu: 0.0.40
codegen_flags: <defaults>
</compile_context>

<pallas_src>
import functools
import math

import jax
import jax.numpy as jnp
from jax import lax
from jax.experimental import pallas as pl
from jax.experimental.pallas import tpu as pltpu


# ----------------------------- Pallas kernel ---------------------------------


def _layernorm(v, w, b, eps=1e-5):
    mu = jnp.mean(v, axis=-1, keepdims=True)
    var = jnp.mean((v - mu) ** 2, axis=-1, keepdims=True)
    return (v - mu) * lax.rsqrt(var + eps) * w + b


def _encoder_layer_kernel(xf_ref,
                          ln1_w_ref, ln1_b_ref,
                          wq_ref, wk_ref, wv_ref,
                          bq_ref, bk_ref, bv_ref,
                          wo_ref, bo_ref,
                          ln2_w_ref, ln2_b_ref,
                          w1_ref, b1_ref,
                          w2_ref, b2_ref,
                          o_ref,
                          q_scr, k_scr, v_scr,
                          *, num_heads, head_dim, tq, seq_len):
    # xf_ref : (L_pad, E) full (padded) sequence of this batch element
    # *_scr  : (H, L_pad, Dh) bf16 per-head Q/K/V, filled once per batch element
    H, Dh, TQ = num_heads, head_dim, tq
    L_pad, E = xf_ref.shape
    scale = 1.0 / math.sqrt(Dh)

    # ---- per-batch init: LayerNorm(full seq) + lane-dense Q/K/V projections ----
    @pl.when(pl.program_id(1) == 0)
    def _init():
        xf = xf_ref[...].astype(jnp.float32)                      # (L_pad, E)
        xfn = _layernorm(xf, ln1_w_ref[...], ln1_b_ref[...])
        xfn_b = xfn.astype(jnp.bfloat16)
        # Three (rows, E) @ (E, E) matmuls (MXU lane-dense), then one head split
        # into scratch, amortized once per batch element.
        for w_ref, b_ref, scr in ((wq_ref, bq_ref, q_scr),
                                  (wk_ref, bk_ref, k_scr),
                                  (wv_ref, bv_ref, v_scr)):
            proj = jnp.dot(xfn_b, w_ref[...],
                           preferred_element_type=jnp.float32) + b_ref[...]
            for h in range(H):
                scr[h] = proj[:, h * Dh:(h + 1) * Dh].astype(jnp.bfloat16)

    # ---- per query-tile work ----------------------------------------------------
    qi = pl.program_id(1)
    q_start = pl.multiple_of(qi * TQ, TQ)

    xq = xf_ref[pl.ds(q_start, TQ), :].astype(jnp.float32)        # (TQ, E) residual rows
    q = q_scr[:, pl.ds(q_start, TQ), :]                           # (H, TQ, Dh) bf16

    # Scores for all heads in one batched dot (contracting on Dh, no K transpose).
    s = jnp.einsum("hqd,hkd->hqk", q, k_scr[...],
                   preferred_element_type=jnp.float32) * scale    # (H, TQ, L_pad)
    if L_pad != seq_len:                                          # mask padded keys
        key_idx = lax.broadcasted_iota(jnp.int32, s.shape, 2)
        s = jnp.where(key_idx < seq_len, s, -1e30)

    # Softmax in f32; reciprocal on the EUP.
    s = s - jnp.max(s, axis=-1, keepdims=True)
    p = jnp.exp(s)
    p = p * pl.reciprocal(jnp.sum(p, axis=-1, keepdims=True), approx=True)

    a = jnp.einsum("hqk,hkd->hqd", p.astype(jnp.bfloat16), v_scr[...],
                   preferred_element_type=jnp.float32)            # (H, TQ, Dh)

    # Output projection: accumulate per-head dots into one (TQ, E) f32 accumulator
    # (no (H, TQ, E) intermediate, no concatenate).
    attn = jnp.zeros((TQ, E), jnp.float32)
    for h in range(H):
        attn = attn + jnp.dot(a[h].astype(jnp.bfloat16), wo_ref[h],
                              preferred_element_type=jnp.float32)
    attn = attn + bo_ref[...]

    h1 = xq + attn                                                # residual 1

    # ---- sublayer 2: pre-norm FFN + residual -----------------------------------
    h1n = _layernorm(h1, ln2_w_ref[...], ln2_b_ref[...])
    ff = jnp.dot(h1n.astype(jnp.bfloat16), w1_ref[...],
                 preferred_element_type=jnp.float32) + b1_ref[...]
    ff = jnp.maximum(ff, 0.0)                                     # ReLU
    ff = jnp.dot(ff.astype(jnp.bfloat16), w2_ref[...],
                 preferred_element_type=jnp.float32) + b2_ref[...]

    o_ref[...] = (h1 + ff).astype(o_ref.dtype)


# ------------------------------- wrapper --------------------------------------


def _round_up(a, b):
    return (a + b - 1) // b * b


def transformer_encoder_layer(x_lne, params, num_heads):
    """x_lne: (L, N, E) float32 (PyTorch nn.MultiheadAttention default layout)."""
    L, N, E = x_lne.shape
    H = num_heads
    Dh = E // H
    FF = params["w1"].shape[1]

    x = jnp.transpose(x_lne, (1, 0, 2))                           # (N, L, E)

    # Query tiling / padding: bound the per-step score tile to (H, TQ, L_pad);
    # never materialize an unblocked (H, L, L) score matrix.
    if L > 128:
        L_pad = _round_up(L, 128)
        TQ = 128
    else:
        L_pad = _round_up(L, 8)
        TQ = L_pad
    n_qt = L_pad // TQ
    if L_pad != L:
        x = jnp.pad(x, ((0, 0), (0, L_pad - L), (0, 0)))

    # Packed, lane-dense projection weights (bf16 for the MXU, x @ W layout).
    w_qkv = params["w_qkv"]                                       # (E, 3E)
    wq = w_qkv[:, 0 * E:1 * E].astype(jnp.bfloat16)
    wk = w_qkv[:, 1 * E:2 * E].astype(jnp.bfloat16)
    wv = w_qkv[:, 2 * E:3 * E].astype(jnp.bfloat16)
    bq = params["b_qkv"][:, 0 * E:1 * E]
    bk = params["b_qkv"][:, 1 * E:2 * E]
    bv = params["b_qkv"][:, 2 * E:3 * E]
    wo = params["w_o"].reshape(H, Dh, E).astype(jnp.bfloat16)     # head-major slabs
    w1 = params["w1"].astype(jnp.bfloat16)
    w2 = params["w2"].astype(jnp.bfloat16)

    # Constant operands: whole array resident in VMEM, not pipelined per step.
    vmem_spec = pl.BlockSpec(memory_space=pltpu.MemorySpace.VMEM)

    flops_per_batch = (2 * L_pad * E * 3 * E          # QKV projection (once per batch)
                       + 4 * L_pad * L_pad * E        # scores + PV
                       + 2 * L_pad * E * E            # output projection
                       + 4 * L_pad * E * FF)          # FFN
    weight_bytes = 2 * (4 * E * E + 2 * E * FF)
    cost = pl.CostEstimate(
        flops=N * flops_per_batch,
        transcendentals=N * H * L_pad * L_pad,
        bytes_accessed=2 * N * L_pad * E * 4 + weight_bytes)

    kernel = functools.partial(_encoder_layer_kernel,
                               num_heads=H, head_dim=Dh, tq=TQ, seq_len=L)

    out = pl.pallas_call(
        kernel,
        out_shape=jax.ShapeDtypeStruct((N, L_pad, E), x.dtype),
        grid_spec=pltpu.PrefetchScalarGridSpec(
            num_scalar_prefetch=0,
            grid=(N, n_qt),
            in_specs=[
                # single full-sequence input (residual rows + K/V source)
                pl.BlockSpec((pl.Squeezed(), L_pad, E), lambda b, qi: (b, 0, 0)),
                vmem_spec,   # ln1 w
                vmem_spec,   # ln1 b
                vmem_spec,   # Wq (E, E)
                vmem_spec,   # Wk (E, E)
                vmem_spec,   # Wv (E, E)
                vmem_spec,   # bq (1, E)
                vmem_spec,   # bk (1, E)
                vmem_spec,   # bv (1, E)
                vmem_spec,   # Wo (H, Dh, E)
                vmem_spec,   # bo (1, E)
                vmem_spec,   # ln2 w
                vmem_spec,   # ln2 b
                vmem_spec,   # ffn w1 (E, FF)
                vmem_spec,   # ffn b1
                vmem_spec,   # ffn w2 (FF, E)
                vmem_spec,   # ffn b2
            ],
            out_specs=pl.BlockSpec((pl.Squeezed(), TQ, E), lambda b, qi: (b, qi, 0)),
            scratch_shapes=[
                pltpu.VMEM((H, L_pad, Dh), jnp.bfloat16),   # Q (all heads, full seq)
                pltpu.VMEM((H, L_pad, Dh), jnp.bfloat16),   # K
                pltpu.VMEM((H, L_pad, Dh), jnp.bfloat16),   # V
            ]),
        compiler_params=pltpu.CompilerParams(
            # Batch axis shards across megacore TCs; query-tile axis must run
            # sequentially so the per-batch Q/K/V scratch persists across qi steps.
            dimension_semantics=("parallel", "arbitrary"),
            vmem_limit_bytes=48 * 1024 * 1024),
        cost_estimate=cost,
    )(x,
      params["ln1_w"], params["ln1_b"],
      wq, wk, wv, bq, bk, bv,
      wo, params["b_o"],
      params["ln2_w"], params["ln2_b"],
      w1, params["b1"],
      w2, params["b2"])

    if L_pad != L:
        out = out[:, :L, :]
    return jnp.transpose(out, (1, 0, 2))                          # back to (L, N, E)


# --------------------------- pure-JAX reference --------------------------------


def reference(x_lne, params, num_heads):
    L, N, E = x_lne.shape
    Dh = E // num_heads

    def ln(v, w, b):
        mu = jnp.mean(v, axis=-1, keepdims=True)
        var = jnp.mean((v - mu) ** 2, axis=-1, keepdims=True)
        return (v - mu) / jnp.sqrt(var + 1e-5) * w + b

    x = jnp.transpose(x_lne, (1, 0, 2))                      # (N, L, E)
    xn = ln(x, params["ln1_w"], params["ln1_b"])
    qkv = xn @ params["w_qkv"] + params["b_qkv"]             # (N, L, 3E)
    q, k, v = jnp.split(qkv, 3, axis=-1)
    q = q.reshape(N, L, num_heads, Dh).transpose(0, 2, 1, 3)
    k = k.reshape(N, L, num_heads, Dh).transpose(0, 2, 1, 3)
    v = v.reshape(N, L, num_heads, Dh).transpose(0, 2, 1, 3)
    s = jnp.einsum("nhqd,nhkd->nhqk", q, k) / math.sqrt(Dh)
    p = jax.nn.softmax(s, axis=-1)
    a = jnp.einsum("nhqk,nhkd->nhqd", p, v).transpose(0, 2, 1, 3).reshape(N, L, E)
    a = a @ params["w_o"] + params["b_o"]
    h1 = x + a
    h1n = ln(h1, params["ln2_w"], params["ln2_b"])
    ff = jnp.maximum(h1n @ params["w1"] + params["b1"], 0.0) @ params["w2"] + params["b2"]
    out = h1 + ff
    return jnp.transpose(out, (1, 0, 2))


# ----------------------------------- main ---------------------------------------


if __name__ == "__main__":
    L, N, E, H, FF = 8, 2, 32, 4, 64   # seq, batch, embed, heads, ff_dim

    key = jax.random.PRNGKey(0)
    keys = jax.random.split(key, 16)

    def rnd(k, shape, scale=0.05):
        return (scale * jax.random.normal(k, shape)).astype(jnp.float32)

    # Weights stored pre-transposed so the math is x @ W (PyTorch Linear: x @ W^T).
    params = {
        "ln1_w": jnp.ones((1, E), jnp.float32),
        "ln1_b": jnp.zeros((1, E), jnp.float32),
        "w_qkv": rnd(keys[0], (E, 3 * E)),
        "b_qkv": rnd(keys[1], (1, 3 * E)),
        "w_o":   rnd(keys[2], (E, E)),
        "b_o":   rnd(keys[3], (1, E)),
        "ln2_w": jnp.ones((1, E), jnp.float32),
        "ln2_b": jnp.zeros((1, E), jnp.float32),
        "w1":    rnd(keys[4], (E, FF)),
        "b1":    rnd(keys[5], (1, FF)),
        "w2":    rnd(keys[6], (FF, E)),
        "b2":    rnd(keys[7], (1, E)),
    }

    x = jax.random.normal(keys[8], (L, N, E), dtype=jnp.float32)

    out = transformer_encoder_layer(x, params, num_heads=H)
    out = jax.block_until_ready(out)

    ref = reference(x, params, num_heads=H)
    assert out.shape == (L, N, E)
    # bf16 MXU operands + approx reciprocal => looser tolerance than pure-f32.
    assert jnp.allclose(out, ref, atol=3e-2, rtol=3e-2), "mismatch vs pure-JAX reference"

    print("KERNEL_OK")
</pallas_src>

<mosaic_0001>
module attributes {stable_mosaic.version = 11 : i64} {
  func.func @_encoder_layer_kernel(%arg0: i32, %arg1: i32, %arg2: memref<1x8x32xf32, #tpu.memory_space<vmem>>, %arg3: memref<1x32xf32, #tpu.memory_space<vmem>>, %arg4: memref<1x32xf32, #tpu.memory_space<vmem>>, %arg5: memref<32x32xbf16, #tpu.memory_space<vmem>>, %arg6: memref<32x32xbf16, #tpu.memory_space<vmem>>, %arg7: memref<32x32xbf16, #tpu.memory_space<vmem>>, %arg8: memref<1x32xf32, #tpu.memory_space<vmem>>, %arg9: memref<1x32xf32, #tpu.memory_space<vmem>>, %arg10: memref<1x32xf32, #tpu.memory_space<vmem>>, %arg11: memref<4x8x32xbf16, #tpu.memory_space<vmem>>, %arg12: memref<1x32xf32, #tpu.memory_space<vmem>>, %arg13: memref<1x32xf32, #tpu.memory_space<vmem>>, %arg14: memref<1x32xf32, #tpu.memory_space<vmem>>, %arg15: memref<32x64xbf16, #tpu.memory_space<vmem>>, %arg16: memref<1x64xf32, #tpu.memory_space<vmem>>, %arg17: memref<64x32xbf16, #tpu.memory_space<vmem>>, %arg18: memref<1x32xf32, #tpu.memory_space<vmem>>, %arg19: memref<1x8x32xf32, #tpu.memory_space<vmem>>, %arg20: memref<4x8x8xbf16, #tpu.memory_space<vmem>>, %arg21: memref<4x8x8xbf16, #tpu.memory_space<vmem>>, %arg22: memref<4x8x8xbf16, #tpu.memory_space<vmem>>) attributes {dimension_semantics = [#tpu.dimension_semantics<parallel>, #tpu.dimension_semantics<arbitrary>], iteration_bounds = array<i64: 2, 1>, scalar_prefetch = 0 : i64, scratch_operands = 3 : i64, tpu.core_type = #tpu.core_type<tc>, window_params = [{transform_indices = @transform_0, window_bounds = array<i64: 1, 8, 32>}, {pipeline_mode = #tpu.pipeline_mode<synchronous>, transform_indices = @transform_1, window_bounds = array<i64: 1, 32>}, {pipeline_mode = #tpu.pipeline_mode<synchronous>, transform_indices = @transform_2, window_bounds = array<i64: 1, 32>}, {pipeline_mode = #tpu.pipeline_mode<synchronous>, transform_indices = @transform_3, window_bounds = array<i64: 32, 32>}, {pipeline_mode = #tpu.pipeline_mode<synchronous>, transform_indices = @transform_4, window_bounds = array<i64: 32, 32>}, {pipeline_mode = #tpu.pipeline_mode<synchronous>, transform_indices = @transform_5, window_bounds = array<i64: 32, 32>}, {pipeline_mode = #tpu.pipeline_mode<synchronous>, transform_indices = @transform_6, window_bounds = array<i64: 1, 32>}, {pipeline_mode = #tpu.pipeline_mode<synchronous>, transform_indices = @transform_7, window_bounds = array<i64: 1, 32>}, {pipeline_mode = #tpu.pipeline_mode<synchronous>, transform_indices = @transform_8, window_bounds = array<i64: 1, 32>}, {pipeline_mode = #tpu.pipeline_mode<synchronous>, transform_indices = @transform_9, window_bounds = array<i64: 4, 8, 32>}, {pipeline_mode = #tpu.pipeline_mode<synchronous>, transform_indices = @transform_10, window_bounds = array<i64: 1, 32>}, {pipeline_mode = #tpu.pipeline_mode<synchronous>, transform_indices = @transform_11, window_bounds = array<i64: 1, 32>}, {pipeline_mode = #tpu.pipeline_mode<synchronous>, transform_indices = @transform_12, window_bounds = array<i64: 1, 32>}, {pipeline_mode = #tpu.pipeline_mode<synchronous>, transform_indices = @transform_13, window_bounds = array<i64: 32, 64>}, {pipeline_mode = #tpu.pipeline_mode<synchronous>, transform_indices = @transform_14, window_bounds = array<i64: 1, 64>}, {pipeline_mode = #tpu.pipeline_mode<synchronous>, transform_indices = @transform_15, window_bounds = array<i64: 64, 32>}, {pipeline_mode = #tpu.pipeline_mode<synchronous>, transform_indices = @transform_16, window_bounds = array<i64: 1, 32>}, {transform_indices = @transform_17, window_bounds = array<i64: 1, 8, 32>}]} {
    %c0_i32 = arith.constant 0 : i32
    %0 = arith.cmpi eq, %arg1, %c0_i32 : i32
    %1 = arith.extui %0 : i1 to i32
    %c0_i32_0 = arith.constant 0 : i32
    %2 = arith.cmpi ne, %1, %c0_i32_0 : i32
    scf.if %2 {
      %c0_53 = arith.constant 0 : index
      %c0_54 = arith.constant 0 : index
      %c0_55 = arith.constant 0 : index
      %102 = vector.load %arg2[%c0_53, %c0_54, %c0_55] : memref<1x8x32xf32, #tpu.memory_space<vmem>>, vector<1x8x32xf32>
      %103 = vector.shape_cast %102 : vector<1x8x32xf32> to vector<8x32xf32>
      %c0_56 = arith.constant 0 : index
      %c0_57 = arith.constant 0 : index
      %104 = vector.load %arg3[%c0_56, %c0_57] : memref<1x32xf32, #tpu.memory_space<vmem>>, vector<1x32xf32>
      %c0_58 = arith.constant 0 : index
      %c0_59 = arith.constant 0 : index
      %105 = vector.load %arg4[%c0_58, %c0_59] : memref<1x32xf32, #tpu.memory_space<vmem>>, vector<1x32xf32>
      %cst_60 = arith.constant dense<0.000000e+00> : vector<8xf32>
      %106 = vector.multi_reduction <add>, %103, %cst_60 [1] : vector<8x32xf32> to vector<8xf32>
      %107 = vector.shape_cast %106 : vector<8xf32> to vector<8x1xf32>
      %cst_61 = arith.constant 3.200000e+01 : f32
      %108 = vector.broadcast %cst_61 : f32 to vector<8x1xf32>
      %109 = arith.divf %107, %108 : vector<8x1xf32>
      %110 = vector.broadcast %109 : vector<8x1xf32> to vector<8x32xf32>
      %111 = arith.subf %103, %110 : vector<8x32xf32>
      %112 = arith.mulf %111, %111 : vector<8x32xf32>
      %cst_62 = arith.constant dense<0.000000e+00> : vector<8xf32>
      %113 = vector.multi_reduction <add>, %112, %cst_62 [1] : vector<8x32xf32> to vector<8xf32>
      %114 = vector.shape_cast %113 : vector<8xf32> to vector<8x1xf32>
      %cst_63 = arith.constant 3.200000e+01 : f32
      %115 = vector.broadcast %cst_63 : f32 to vector<8x1xf32>
      %116 = arith.divf %114, %115 : vector<8x1xf32>
      %117 = vector.broadcast %109 : vector<8x1xf32> to vector<8x32xf32>
      %118 = arith.subf %103, %117 : vector<8x32xf32>
      %cst_64 = arith.constant 9.99999974E-6 : f32
      %119 = vector.broadcast %cst_64 : f32 to vector<8x1xf32>
      %120 = arith.addf %116, %119 : vector<8x1xf32>
      %121 = math.rsqrt %120 : vector<8x1xf32>
      %122 = vector.broadcast %121 : vector<8x1xf32> to vector<8x32xf32>
      %123 = arith.mulf %118, %122 : vector<8x32xf32>
      %124 = vector.broadcast %104 : vector<1x32xf32> to vector<8x32xf32>
      %125 = arith.mulf %123, %124 : vector<8x32xf32>
      %126 = vector.broadcast %105 : vector<1x32xf32> to vector<8x32xf32>
      %127 = arith.addf %125, %126 : vector<8x32xf32>
      %128 = arith.truncf %127 : vector<8x32xf32> to vector<8x32xbf16>
      %c0_65 = arith.constant 0 : index
      %c0_66 = arith.constant 0 : index
      %129 = vector.load %arg5[%c0_65, %c0_66] : memref<32x32xbf16, #tpu.memory_space<vmem>>, vector<32x32xbf16>
      %cst_67 = arith.constant dense<0.000000e+00> : vector<8x32xf32>
      %130 = tpu.matmul %128, %129, %cst_67 {dimension_numbers = #tpu.dot_dimension_numbers<[1], [0], [0], [1], [0, 0, 1, 1], [], []>} : vector<8x32xbf16>, vector<32x32xbf16>, vector<8x32xf32> -> vector<8x32xf32>
      %c0_68 = arith.constant 0 : index
      %c0_69 = arith.constant 0 : index
      %131 = vector.load %arg8[%c0_68, %c0_69] : memref<1x32xf32, #tpu.memory_space<vmem>>, vector<1x32xf32>
      %132 = vector.broadcast %131 : vector<1x32xf32> to vector<8x32xf32>
      %133 = arith.addf %130, %132 : vector<8x32xf32>
      %134 = vector.extract_strided_slice %133 {offsets = [0, 0], sizes = [8, 8], strides = [1, 1]} : vector<8x32xf32> to vector<8x8xf32>
      %135 = arith.truncf %134 : vector<8x8xf32> to vector<8x8xbf16>
      %c0_70 = arith.constant 0 : index
      %c0_71 = arith.constant 0 : index
      %c0_72 = arith.constant 0 : index
      %136 = vector.load %arg20[%c0_70, %c0_71, %c0_72] : memref<4x8x8xbf16, #tpu.memory_space<vmem>>, vector<1x8x8xbf16>
      %137 = vector.shape_cast %136 : vector<1x8x8xbf16> to vector<8x8xbf16>
      %138 = vector.shape_cast %135 : vector<8x8xbf16> to vector<1x8x8xbf16>
      tpu.vector_store %arg20[%c0_70, %c0_71, %c0_72], %138 {strides = array<i32>} : memref<4x8x8xbf16, #tpu.memory_space<vmem>>, vector<1x8x8xbf16>,
      %139 = vector.extract_strided_slice %133 {offsets = [0, 8], sizes = [8, 8], strides = [1, 1]} : vector<8x32xf32> to vector<8x8xf32>
      %140 = arith.truncf %139 : vector<8x8xf32> to vector<8x8xbf16>
      %c1_73 = arith.constant 1 : index
      %c0_74 = arith.constant 0 : index
      %c0_75 = arith.constant 0 : index
      %141 = vector.load %arg20[%c1_73, %c0_74, %c0_75] : memref<4x8x8xbf16, #tpu.memory_space<vmem>>, vector<1x8x8xbf16>
      %142 = vector.shape_cast %141 : vector<1x8x8xbf16> to vector<8x8xbf16>
      %143 = vector.shape_cast %140 : vector<8x8xbf16> to vector<1x8x8xbf16>
      tpu.vector_store %arg20[%c1_73, %c0_74, %c0_75], %143 {strides = array<i32>} : memref<4x8x8xbf16, #tpu.memory_space<vmem>>, vector<1x8x8xbf16>,
      %144 = vector.extract_strided_slice %133 {offsets = [0, 16], sizes = [8, 8], strides = [1, 1]} : vector<8x32xf32> to vector<8x8xf32>
      %145 = arith.truncf %144 : vector<8x8xf32> to vector<8x8xbf16>
      %c2_76 = arith.constant 2 : index
      %c0_77 = arith.constant 0 : index
      %c0_78 = arith.constant 0 : index
      %146 = vector.load %arg20[%c2_76, %c0_77, %c0_78] : memref<4x8x8xbf16, #tpu.memory_space<vmem>>, vector<1x8x8xbf16>
      %147 = vector.shape_cast %146 : vector<1x8x8xbf16> to vector<8x8xbf16>
      %148 = vector.shape_cast %145 : vector<8x8xbf16> to vector<1x8x8xbf16>
      tpu.vector_store %arg20[%c2_76, %c0_77, %c0_78], %148 {strides = array<i32>} : memref<4x8x8xbf16, #tpu.memory_space<vmem>>, vector<1x8x8xbf16>,
      %149 = vector.extract_strided_slice %133 {offsets = [0, 24], sizes = [8, 8], strides = [1, 1]} : vector<8x32xf32> to vector<8x8xf32>
      %150 = arith.truncf %149 : vector<8x8xf32> to vector<8x8xbf16>
      %c3_79 = arith.constant 3 : index
      %c0_80 = arith.constant 0 : index
      %c0_81 = arith.constant 0 : index
      %151 = vector.load %arg20[%c3_79, %c0_80, %c0_81] : memref<4x8x8xbf16, #tpu.memory_space<vmem>>, vector<1x8x8xbf16>
      %152 = vector.shape_cast %151 : vector<1x8x8xbf16> to vector<8x8xbf16>
      %153 = vector.shape_cast %150 : vector<8x8xbf16> to vector<1x8x8xbf16>
      tpu.vector_store %arg20[%c3_79, %c0_80, %c0_81], %153 {strides = array<i32>} : memref<4x8x8xbf16, #tpu.memory_space<vmem>>, vector<1x8x8xbf16>,
      %c0_82 = arith.constant 0 : index
      %c0_83 = arith.constant 0 : index
      %154 = vector.load %arg6[%c0_82, %c0_83] : memref<32x32xbf16, #tpu.memory_space<vmem>>, vector<32x32xbf16>
      %cst_84 = arith.constant dense<0.000000e+00> : vector<8x32xf32>
      %155 = tpu.matmul %128, %154, %cst_84 {dimension_numbers = #tpu.dot_dimension_numbers<[1], [0], [0], [1], [0, 0, 1, 1], [], []>} : vector<8x32xbf16>, vector<32x32xbf16>, vector<8x32xf32> -> vector<8x32xf32>
      %c0_85 = arith.constant 0 : index
      %c0_86 = arith.constant 0 : index
      %156 = vector.load %arg9[%c0_85, %c0_86] : memref<1x32xf32, #tpu.memory_space<vmem>>, vector<1x32xf32>
      %157 = vector.broadcast %156 : vector<1x32xf32> to vector<8x32xf32>
      %158 = arith.addf %155, %157 : vector<8x32xf32>
      %159 = vector.extract_strided_slice %158 {offsets = [0, 0], sizes = [8, 8], strides = [1, 1]} : vector<8x32xf32> to vector<8x8xf32>
      %160 = arith.truncf %159 : vector<8x8xf32> to vector<8x8xbf16>
      %c0_87 = arith.constant 0 : index
      %c0_88 = arith.constant 0 : index
      %c0_89 = arith.constant 0 : index
      %161 = vector.load %arg21[%c0_87, %c0_88, %c0_89] : memref<4x8x8xbf16, #tpu.memory_space<vmem>>, vector<1x8x8xbf16>
      %162 = vector.shape_cast %161 : vector<1x8x8xbf16> to vector<8x8xbf16>
      %163 = vector.shape_cast %160 : vector<8x8xbf16> to vector<1x8x8xbf16>
      tpu.vector_store %arg21[%c0_87, %c0_88, %c0_89], %163 {strides = array<i32>} : memref<4x8x8xbf16, #tpu.memory_space<vmem>>, vector<1x8x8xbf16>,
      %164 = vector.extract_strided_slice %158 {offsets = [0, 8], sizes = [8, 8], strides = [1, 1]} : vector<8x32xf32> to vector<8x8xf32>
      %165 = arith.truncf %164 : vector<8x8xf32> to vector<8x8xbf16>
      %c1_90 = arith.constant 1 : index
      %c0_91 = arith.constant 0 : index
      %c0_92 = arith.constant 0 : index
      %166 = vector.load %arg21[%c1_90, %c0_91, %c0_92] : memref<4x8x8xbf16, #tpu.memory_space<vmem>>, vector<1x8x8xbf16>
      %167 = vector.shape_cast %166 : vector<1x8x8xbf16> to vector<8x8xbf16>
      %168 = vector.shape_cast %165 : vector<8x8xbf16> to vector<1x8x8xbf16>
      tpu.vector_store %arg21[%c1_90, %c0_91, %c0_92], %168 {strides = array<i32>} : memref<4x8x8xbf16, #tpu.memory_space<vmem>>, vector<1x8x8xbf16>,
      %169 = vector.extract_strided_slice %158 {offsets = [0, 16], sizes = [8, 8], strides = [1, 1]} : vector<8x32xf32> to vector<8x8xf32>
      %170 = arith.truncf %169 : vector<8x8xf32> to vector<8x8xbf16>
      %c2_93 = arith.constant 2 : index
      %c0_94 = arith.constant 0 : index
      %c0_95 = arith.constant 0 : index
      %171 = vector.load %arg21[%c2_93, %c0_94, %c0_95] : memref<4x8x8xbf16, #tpu.memory_space<vmem>>, vector<1x8x8xbf16>
      %172 = vector.shape_cast %171 : vector<1x8x8xbf16> to vector<8x8xbf16>
      %173 = vector.shape_cast %170 : vector<8x8xbf16> to vector<1x8x8xbf16>
      tpu.vector_store %arg21[%c2_93, %c0_94, %c0_95], %173 {strides = array<i32>} : memref<4x8x8xbf16, #tpu.memory_space<vmem>>, vector<1x8x8xbf16>,
      %174 = vector.extract_strided_slice %158 {offsets = [0, 24], sizes = [8, 8], strides = [1, 1]} : vector<8x32xf32> to vector<8x8xf32>
      %175 = arith.truncf %174 : vector<8x8xf32> to vector<8x8xbf16>
      %c3_96 = arith.constant 3 : index
      %c0_97 = arith.constant 0 : index
      %c0_98 = arith.constant 0 : index
      %176 = vector.load %arg21[%c3_96, %c0_97, %c0_98] : memref<4x8x8xbf16, #tpu.memory_space<vmem>>, vector<1x8x8xbf16>
      %177 = vector.shape_cast %176 : vector<1x8x8xbf16> to vector<8x8xbf16>
      %178 = vector.shape_cast %175 : vector<8x8xbf16> to vector<1x8x8xbf16>
      tpu.vector_store %arg21[%c3_96, %c0_97, %c0_98], %178 {strides = array<i32>} : memref<4x8x8xbf16, #tpu.memory_space<vmem>>, vector<1x8x8xbf16>,
      %c0_99 = arith.constant 0 : index
      %c0_100 = arith.constant 0 : index
      %179 = vector.load %arg7[%c0_99, %c0_100] : memref<32x32xbf16, #tpu.memory_space<vmem>>, vector<32x32xbf16>
      %cst_101 = arith.constant dense<0.000000e+00> : vector<8x32xf32>
      %180 = tpu.matmul %128, %179, %cst_101 {dimension_numbers = #tpu.dot_dimension_numbers<[1], [0], [0], [1], [0, 0, 1, 1], [], []>} : vector<8x32xbf16>, vector<32x32xbf16>, vector<8x32xf32> -> vector<8x32xf32>
      %c0_102 = arith.constant 0 : index
      %c0_103 = arith.constant 0 : index
      %181 = vector.load %arg10[%c0_102, %c0_103] : memref<1x32xf32, #tpu.memory_space<vmem>>, vector<1x32xf32>
      %182 = vector.broadcast %181 : vector<1x32xf32> to vector<8x32xf32>
      %183 = arith.addf %180, %182 : vector<8x32xf32>
      %184 = vector.extract_strided_slice %183 {offsets = [0, 0], sizes = [8, 8], strides = [1, 1]} : vector<8x32xf32> to vector<8x8xf32>
      %185 = arith.truncf %184 : vector<8x8xf32> to vector<8x8xbf16>
      %c0_104 = arith.constant 0 : index
      %c0_105 = arith.constant 0 : index
      %c0_106 = arith.constant 0 : index
      %186 = vector.load %arg22[%c0_104, %c0_105, %c0_106] : memref<4x8x8xbf16, #tpu.memory_space<vmem>>, vector<1x8x8xbf16>
      %187 = vector.shape_cast %186 : vector<1x8x8xbf16> to vector<8x8xbf16>
      %188 = vector.shape_cast %185 : vector<8x8xbf16> to vector<1x8x8xbf16>
      tpu.vector_store %arg22[%c0_104, %c0_105, %c0_106], %188 {strides = array<i32>} : memref<4x8x8xbf16, #tpu.memory_space<vmem>>, vector<1x8x8xbf16>,
      %189 = vector.extract_strided_slice %183 {offsets = [0, 8], sizes = [8, 8], strides = [1, 1]} : vector<8x32xf32> to vector<8x8xf32>
      %190 = arith.truncf %189 : vector<8x8xf32> to vector<8x8xbf16>
      %c1_107 = arith.constant 1 : index
      %c0_108 = arith.constant 0 : index
      %c0_109 = arith.constant 0 : index
      %191 = vector.load %arg22[%c1_107, %c0_108, %c0_109] : memref<4x8x8xbf16, #tpu.memory_space<vmem>>, vector<1x8x8xbf16>
      %192 = vector.shape_cast %191 : vector<1x8x8xbf16> to vector<8x8xbf16>
      %193 = vector.shape_cast %190 : vector<8x8xbf16> to vector<1x8x8xbf16>
      tpu.vector_store %arg22[%c1_107, %c0_108, %c0_109], %193 {strides = array<i32>} : memref<4x8x8xbf16, #tpu.memory_space<vmem>>, vector<1x8x8xbf16>,
      %194 = vector.extract_strided_slice %183 {offsets = [0, 16], sizes = [8, 8], strides = [1, 1]} : vector<8x32xf32> to vector<8x8xf32>
      %195 = arith.truncf %194 : vector<8x8xf32> to vector<8x8xbf16>
      %c2_110 = arith.constant 2 : index
      %c0_111 = arith.constant 0 : index
      %c0_112 = arith.constant 0 : index
      %196 = vector.load %arg22[%c2_110, %c0_111, %c0_112] : memref<4x8x8xbf16, #tpu.memory_space<vmem>>, vector<1x8x8xbf16>
      %197 = vector.shape_cast %196 : vector<1x8x8xbf16> to vector<8x8xbf16>
      %198 = vector.shape_cast %195 : vector<8x8xbf16> to vector<1x8x8xbf16>
      tpu.vector_store %arg22[%c2_110, %c0_111, %c0_112], %198 {strides = array<i32>} : memref<4x8x8xbf16, #tpu.memory_space<vmem>>, vector<1x8x8xbf16>,
      %199 = vector.extract_strided_slice %183 {offsets = [0, 24], sizes = [8, 8], strides = [1, 1]} : vector<8x32xf32> to vector<8x8xf32>
      %200 = arith.truncf %199 : vector<8x8xf32> to vector<8x8xbf16>
      %c3_113 = arith.constant 3 : index
      %c0_114 = arith.constant 0 : index
      %c0_115 = arith.constant 0 : index
      %201 = vector.load %arg22[%c3_113, %c0_114, %c0_115] : memref<4x8x8xbf16, #tpu.memory_space<vmem>>, vector<1x8x8xbf16>
      %202 = vector.shape_cast %201 : vector<1x8x8xbf16> to vector<8x8xbf16>
      %203 = vector.shape_cast %200 : vector<8x8xbf16> to vector<1x8x8xbf16>
      tpu.vector_store %arg22[%c3_113, %c0_114, %c0_115], %203 {strides = array<i32>} : memref<4x8x8xbf16, #tpu.memory_space<vmem>>, vector<1x8x8xbf16>,
    } else {
    }
    %c8_i32 = arith.constant 8 : i32
    %3 = arith.muli %arg1, %c8_i32 : i32
    %4 = tpu.assume_multiple %3, 8 : i32
    %c0 = arith.constant 0 : index
    %5 = arith.index_cast %4 : i32 to index
    %c0_1 = arith.constant 0 : index
    %6 = vector.load %arg2[%c0, %5, %c0_1] : memref<1x8x32xf32, #tpu.memory_space<vmem>>, vector<1x8x32xf32>
    %7 = vector.shape_cast %6 : vector<1x8x32xf32> to vector<8x32xf32>
    %c0_2 = arith.constant 0 : index
    %8 = arith.index_cast %4 : i32 to index
    %c0_3 = arith.constant 0 : index
    %9 = vector.load %arg20[%c0_2, %8, %c0_3] : memref<4x8x8xbf16, #tpu.memory_space<vmem>>, vector<4x8x8xbf16>
    %c0_4 = arith.constant 0 : index
    %c0_5 = arith.constant 0 : index
    %c0_6 = arith.constant 0 : index
    %10 = vector.load %arg21[%c0_4, %c0_5, %c0_6] : memref<4x8x8xbf16, #tpu.memory_space<vmem>>, vector<4x8x8xbf16>
    "tpu.trace_start"() <{level = 10 : i32, message = "hqd,hkd->hqk"}> : () -> ()
    %cst = arith.constant dense<0.000000e+00> : vector<4x8x8xf32>
    %11 = tpu.matmul %9, %10, %cst {dimension_numbers = #tpu.dot_dimension_numbers<[2], [2], [1], [1], [0, 0, 0, 1, 1, 1], [0], [0]>} : vector<4x8x8xbf16>, vector<4x8x8xbf16>, vector<4x8x8xf32> -> vector<4x8x8xf32>
    "tpu.trace_stop"() : () -> ()
    %cst_7 = arith.constant 0.353553385 : f32
    %12 = vector.broadcast %cst_7 : f32 to vector<4x8x8xf32>
    %13 = arith.mulf %11, %12 : vector<4x8x8xf32>
    %cst_8 = arith.constant dense<0xFF800000> : vector<4x8xf32>
    %14 = vector.multi_reduction <maximumf>, %13, %cst_8 [2] : vector<4x8x8xf32> to vector<4x8xf32>
    %15 = vector.shape_cast %14 : vector<4x8xf32> to vector<4x8x1xf32>
    %16 = vector.broadcast %15 : vector<4x8x1xf32> to vector<4x8x8xf32>
    %17 = arith.subf %13, %16 : vector<4x8x8xf32>
    %18 = math.exp %17 : vector<4x8x8xf32>
    %cst_9 = arith.constant dense<0.000000e+00> : vector<4x8xf32>
    %19 = vector.multi_reduction <add>, %18, %cst_9 [2] : vector<4x8x8xf32> to vector<4x8xf32>
    %20 = vector.shape_cast %19 : vector<4x8xf32> to vector<4x8x1xf32>
    %21 = tpu.reciprocal %20 {approx = true} : vector<4x8x1xf32> -> vector<4x8x1xf32>
    %22 = vector.broadcast %21 : vector<4x8x1xf32> to vector<4x8x8xf32>
    %23 = arith.mulf %18, %22 : vector<4x8x8xf32>
    %24 = arith.truncf %23 : vector<4x8x8xf32> to vector<4x8x8xbf16>
    %c0_10 = arith.constant 0 : index
    %c0_11 = arith.constant 0 : index
    %c0_12 = arith.constant 0 : index
    %25 = vector.load %arg22[%c0_10, %c0_11, %c0_12] : memref<4x8x8xbf16, #tpu.memory_space<vmem>>, vector<4x8x8xbf16>
    "tpu.trace_start"() <{level = 10 : i32, message = "hqk,hkd->hqd"}> : () -> ()
    %cst_13 = arith.constant dense<0.000000e+00> : vector<4x8x8xf32>
    %26 = tpu.matmul %24, %25, %cst_13 {dimension_numbers = #tpu.dot_dimension_numbers<[2], [1], [1], [2], [0, 0, 0, 1, 1, 2], [0], [0]>} : vector<4x8x8xbf16>, vector<4x8x8xbf16>, vector<4x8x8xf32> -> vector<4x8x8xf32>
    %cst_14 = arith.constant 0.000000e+00 : f32
    "tpu.trace_stop"() : () -> ()
    %27 = vector.broadcast %cst_14 : f32 to vector<8x32xf32>
    %28 = vector.extract_strided_slice %26 {offsets = [0, 0, 0], sizes = [1, 8, 8], strides = [1, 1, 1]} : vector<4x8x8xf32> to vector<1x8x8xf32>
    %29 = vector.shape_cast %28 : vector<1x8x8xf32> to vector<8x8xf32>
    %30 = arith.truncf %29 : vector<8x8xf32> to vector<8x8xbf16>
    %c0_15 = arith.constant 0 : index
    %c0_16 = arith.constant 0 : index
    %c0_17 = arith.constant 0 : index
    %31 = vector.load %arg11[%c0_15, %c0_16, %c0_17] : memref<4x8x32xbf16, #tpu.memory_space<vmem>>, vector<1x8x32xbf16>
    %32 = vector.shape_cast %31 : vector<1x8x32xbf16> to vector<8x32xbf16>
    %cst_18 = arith.constant dense<0.000000e+00> : vector<8x32xf32>
    %33 = tpu.matmul %30, %32, %cst_18 {dimension_numbers = #tpu.dot_dimension_numbers<[1], [0], [0], [1], [0, 0, 1, 1], [], []>} : vector<8x8xbf16>, vector<8x32xbf16>, vector<8x32xf32> -> vector<8x32xf32>
    %34 = arith.addf %27, %33 : vector<8x32xf32>
    %35 = vector.extract_strided_slice %26 {offsets = [1, 0, 0], sizes = [1, 8, 8], strides = [1, 1, 1]} : vector<4x8x8xf32> to vector<1x8x8xf32>
    %36 = vector.shape_cast %35 : vector<1x8x8xf32> to vector<8x8xf32>
    %37 = arith.truncf %36 : vector<8x8xf32> to vector<8x8xbf16>
    %c1 = arith.constant 1 : index
    %c0_19 = arith.constant 0 : index
    %c0_20 = arith.constant 0 : index
    %38 = vector.load %arg11[%c1, %c0_19, %c0_20] : memref<4x8x32xbf16, #tpu.memory_space<vmem>>, vector<1x8x32xbf16>
    %39 = vector.shape_cast %38 : vector<1x8x32xbf16> to vector<8x32xbf16>
    %cst_21 = arith.constant dense<0.000000e+00> : vector<8x32xf32>
    %40 = tpu.matmul %37, %39, %cst_21 {dimension_numbers = #tpu.dot_dimension_numbers<[1], [0], [0], [1], [0, 0, 1, 1], [], []>} : vector<8x8xbf16>, vector<8x32xbf16>, vector<8x32xf32> -> vector<8x32xf32>
    %41 = arith.addf %34, %40 : vector<8x32xf32>
    %42 = vector.extract_strided_slice %26 {offsets = [2, 0, 0], sizes = [1, 8, 8], strides = [1, 1, 1]} : vector<4x8x8xf32> to vector<1x8x8xf32>
    %43 = vector.shape_cast %42 : vector<1x8x8xf32> to vector<8x8xf32>
    %44 = arith.truncf %43 : vector<8x8xf32> to vector<8x8xbf16>
    %c2 = arith.constant 2 : index
    %c0_22 = arith.constant 0 : index
    %c0_23 = arith.constant 0 : index
    %45 = vector.load %arg11[%c2, %c0_22, %c0_23] : memref<4x8x32xbf16, #tpu.memory_space<vmem>>, vector<1x8x32xbf16>
    %46 = vector.shape_cast %45 : vector<1x8x32xbf16> to vector<8x32xbf16>
    %cst_24 = arith.constant dense<0.000000e+00> : vector<8x32xf32>
    %47 = tpu.matmul %44, %46, %cst_24 {dimension_numbers = #tpu.dot_dimension_numbers<[1], [0], [0], [1], [0, 0, 1, 1], [], []>} : vector<8x8xbf16>, vector<8x32xbf16>, vector<8x32xf32> -> vector<8x32xf32>
    %48 = arith.addf %41, %47 : vector<8x32xf32>
    %49 = vector.extract_strided_slice %26 {offsets = [3, 0, 0], sizes = [1, 8, 8], strides = [1, 1, 1]} : vector<4x8x8xf32> to vector<1x8x8xf32>
    %50 = vector.shape_cast %49 : vector<1x8x8xf32> to vector<8x8xf32>
    %51 = arith.truncf %50 : vector<8x8xf32> to vector<8x8xbf16>
    %c3 = arith.constant 3 : index
    %c0_25 = arith.constant 0 : index
    %c0_26 = arith.constant 0 : index
    %52 = vector.load %arg11[%c3, %c0_25, %c0_26] : memref<4x8x32xbf16, #tpu.memory_space<vmem>>, vector<1x8x32xbf16>
    %53 = vector.shape_cast %52 : vector<1x8x32xbf16> to vector<8x32xbf16>
    %cst_27 = arith.constant dense<0.000000e+00> : vector<8x32xf32>
    %54 = tpu.matmul %51, %53, %cst_27 {dimension_numbers = #tpu.dot_dimension_numbers<[1], [0], [0], [1], [0, 0, 1, 1], [], []>} : vector<8x8xbf16>, vector<8x32xbf16>, vector<8x32xf32> -> vector<8x32xf32>
    %55 = arith.addf %48, %54 : vector<8x32xf32>
    %c0_28 = arith.constant 0 : index
    %c0_29 = arith.constant 0 : index
    %56 = vector.load %arg12[%c0_28, %c0_29] : memref<1x32xf32, #tpu.memory_space<vmem>>, vector<1x32xf32>
    %57 = vector.broadcast %56 : vector<1x32xf32> to vector<8x32xf32>
    %58 = arith.addf %55, %57 : vector<8x32xf32>
    %59 = arith.addf %7, %58 : vector<8x32xf32>
    %c0_30 = arith.constant 0 : index
    %c0_31 = arith.constant 0 : index
    %60 = vector.load %arg13[%c0_30, %c0_31] : memref<1x32xf32, #tpu.memory_space<vmem>>, vector<1x32xf32>
    %c0_32 = arith.constant 0 : index
    %c0_33 = arith.constant 0 : index
    %61 = vector.load %arg14[%c0_32, %c0_33] : memref<1x32xf32, #tpu.memory_space<vmem>>, vector<1x32xf32>
    %cst_34 = arith.constant dense<0.000000e+00> : vector<8xf32>
    %62 = vector.multi_reduction <add>, %59, %cst_34 [1] : vector<8x32xf32> to vector<8xf32>
    %63 = vector.shape_cast %62 : vector<8xf32> to vector<8x1xf32>
    %cst_35 = arith.constant 3.200000e+01 : f32
    %64 = vector.broadcast %cst_35 : f32 to vector<8x1xf32>
    %65 = arith.divf %63, %64 : vector<8x1xf32>
    %66 = vector.broadcast %65 : vector<8x1xf32> to vector<8x32xf32>
    %67 = arith.subf %59, %66 : vector<8x32xf32>
    %68 = arith.mulf %67, %67 : vector<8x32xf32>
    %cst_36 = arith.constant dense<0.000000e+00> : vector<8xf32>
    %69 = vector.multi_reduction <add>, %68, %cst_36 [1] : vector<8x32xf32> to vector<8xf32>
    %70 = vector.shape_cast %69 : vector<8xf32> to vector<8x1xf32>
    %cst_37 = arith.constant 3.200000e+01 : f32
    %71 = vector.broadcast %cst_37 : f32 to vector<8x1xf32>
    %72 = arith.divf %70, %71 : vector<8x1xf32>
    %73 = vector.broadcast %65 : vector<8x1xf32> to vector<8x32xf32>
    %74 = arith.subf %59, %73 : vector<8x32xf32>
    %cst_38 = arith.constant 9.99999974E-6 : f32
    %75 = vector.broadcast %cst_38 : f32 to vector<8x1xf32>
    %76 = arith.addf %72, %75 : vector<8x1xf32>
    %77 = math.rsqrt %76 : vector<8x1xf32>
    %78 = vector.broadcast %77 : vector<8x1xf32> to vector<8x32xf32>
    %79 = arith.mulf %74, %78 : vector<8x32xf32>
    %80 = vector.broadcast %60 : vector<1x32xf32> to vector<8x32xf32>
    %81 = arith.mulf %79, %80 : vector<8x32xf32>
    %82 = vector.broadcast %61 : vector<1x32xf32> to vector<8x32xf32>
    %83 = arith.addf %81, %82 : vector<8x32xf32>
    %84 = arith.truncf %83 : vector<8x32xf32> to vector<8x32xbf16>
    %c0_39 = arith.constant 0 : index
    %c0_40 = arith.constant 0 : index
    %85 = vector.load %arg15[%c0_39, %c0_40] : memref<32x64xbf16, #tpu.memory_space<vmem>>, vector<32x64xbf16>
    %cst_41 = arith.constant dense<0.000000e+00> : vector<8x64xf32>
    %86 = tpu.matmul %84, %85, %cst_41 {dimension_numbers = #tpu.dot_dimension_numbers<[1], [0], [0], [1], [0, 0, 1, 1], [], []>} : vector<8x32xbf16>, vector<32x64xbf16>, vector<8x64xf32> -> vector<8x64xf32>
    %c0_42 = arith.constant 0 : index
    %c0_43 = arith.constant 0 : index
    %87 = vector.load %arg16[%c0_42, %c0_43] : memref<1x64xf32, #tpu.memory_space<vmem>>, vector<1x64xf32>
    %88 = vector.broadcast %87 : vector<1x64xf32> to vector<8x64xf32>
    %89 = arith.addf %86, %88 : vector<8x64xf32>
    %cst_44 = arith.constant 0.000000e+00 : f32
    %90 = vector.broadcast %cst_44 : f32 to vector<8x64xf32>
    %91 = arith.maximumf %89, %90 : vector<8x64xf32>
    %92 = arith.truncf %91 : vector<8x64xf32> to vector<8x64xbf16>
    %c0_45 = arith.constant 0 : index
    %c0_46 = arith.constant 0 : index
    %93 = vector.load %arg17[%c0_45, %c0_46] : memref<64x32xbf16, #tpu.memory_space<vmem>>, vector<64x32xbf16>
    %cst_47 = arith.constant dense<0.000000e+00> : vector<8x32xf32>
    %94 = tpu.matmul %92, %93, %cst_47 {dimension_numbers = #tpu.dot_dimension_numbers<[1], [0], [0], [1], [0, 0, 1, 1], [], []>} : vector<8x64xbf16>, vector<64x32xbf16>, vector<8x32xf32> -> vector<8x32xf32>
    %c0_48 = arith.constant 0 : index
    %c0_49 = arith.constant 0 : index
    %95 = vector.load %arg18[%c0_48, %c0_49] : memref<1x32xf32, #tpu.memory_space<vmem>>, vector<1x32xf32>
    %96 = vector.broadcast %95 : vector<1x32xf32> to vector<8x32xf32>
    %97 = arith.addf %94, %96 : vector<8x32xf32>
    %98 = arith.addf %59, %97 : vector<8x32xf32>
    %c0_50 = arith.constant 0 : index
    %c0_51 = arith.constant 0 : index
    %c0_52 = arith.constant 0 : index
    %99 = vector.load %arg19[%c0_50, %c0_51, %c0_52] : memref<1x8x32xf32, #tpu.memory_space<vmem>>, vector<1x8x32xf32>
    %100 = vector.shape_cast %99 : vector<1x8x32xf32> to vector<8x32xf32>
    %101 = vector.shape_cast %98 : vector<8x32xf32> to vector<1x8x32xf32>
    tpu.vector_store %arg19[%c0_50, %c0_51, %c0_52], %101 {strides = array<i32>} : memref<1x8x32xf32, #tpu.memory_space<vmem>>, vector<1x8x32xf32>,
    return
  }
  func.func @transform_0(%arg0: i32, %arg1: i32) -> (i32, i32, i32) {
    %c0_i32 = arith.constant 0 : i32
    %c0_i32_0 = arith.constant 0 : i32
    %c0_i32_1 = arith.constant 0 : i32
    return %arg0, %c0_i32, %c0_i32_0 : i32, i32, i32
  }
  func.func @transform_1(%arg0: i32, %arg1: i32) -> (i32, i32) {
    %c0_i32 = arith.constant 0 : i32
    %c0_i32_0 = arith.constant 0 : i32
    %c0_i32_1 = arith.constant 0 : i32
    return %c0_i32, %c0_i32_0 : i32, i32
  }
  func.func @transform_2(%arg0: i32, %arg1: i32) -> (i32, i32) {
    %c0_i32 = arith.constant 0 : i32
    %c0_i32_0 = arith.constant 0 : i32
    %c0_i32_1 = arith.constant 0 : i32
    return %c0_i32, %c0_i32_0 : i32, i32
  }
  func.func @transform_3(%arg0: i32, %arg1: i32) -> (i32, i32) {
    %c0_i32 = arith.constant 0 : i32
    %c0_i32_0 = arith.constant 0 : i32
    %c0_i32_1 = arith.constant 0 : i32
    return %c0_i32, %c0_i32_0 : i32, i32
  }
  func.func @transform_4(%arg0: i32, %arg1: i32) -> (i32, i32) {
    %c0_i32 = arith.constant 0 : i32
    %c0_i32_0 = arith.constant 0 : i32
    %c0_i32_1 = arith.constant 0 : i32
    return %c0_i32, %c0_i32_0 : i32, i32
  }
  func.func @transform_5(%arg0: i32, %arg1: i32) -> (i32, i32) {
    %c0_i32 = arith.constant 0 : i32
    %c0_i32_0 = arith.constant 0 : i32
    %c0_i32_1 = arith.constant 0 : i32
    return %c0_i32, %c0_i32_0 : i32, i32
  }
  func.func @transform_6(%arg0: i32, %arg1: i32) -> (i32, i32) {
    %c0_i32 = arith.constant 0 : i32
    %c0_i32_0 = arith.constant 0 : i32
    %c0_i32_1 = arith.constant 0 : i32
    return %c0_i32, %c0_i32_0 : i32, i32
  }
  func.func @transform_7(%arg0: i32, %arg1: i32) -> (i32, i32) {
    %c0_i32 = arith.constant 0 : i32
    %c0_i32_0 = arith.constant 0 : i32
    %c0_i32_1 = arith.constant 0 : i32
    return %c0_i32, %c0_i32_0 : i32, i32
  }
  func.func @transform_8(%arg0: i32, %arg1: i32) -> (i32, i32) {
    %c0_i32 = arith.constant 0 : i32
    %c0_i32_0 = arith.constant 0 : i32
    %c0_i32_1 = arith.constant 0 : i32
    return %c0_i32, %c0_i32_0 : i32, i32
  }
  func.func @transform_9(%arg0: i32, %arg1: i32) -> (i32, i32, i32) {
    %c0_i32 = arith.constant 0 : i32
    %c0_i32_0 = arith.constant 0 : i32
    %c0_i32_1 = arith.constant 0 : i32
    %c0_i32_2 = arith.constant 0 : i32
    return %c0_i32, %c0_i32_0, %c0_i32_1 : i32, i32, i32
  }
  func.func @transform_10(%arg0: i32, %arg1: i32) -> (i32, i32) {
    %c0_i32 = arith.constant 0 : i32
    %c0_i32_0 = arith.constant 0 : i32
    %c0_i32_1 = arith.constant 0 : i32
    return %c0_i32, %c0_i32_0 : i32, i32
  }
  func.func @transform_11(%arg0: i32, %arg1: i32) -> (i32, i32) {
    %c0_i32 = arith.constant 0 : i32
    %c0_i32_0 = arith.constant 0 : i32
    %c0_i32_1 = arith.constant 0 : i32
    return %c0_i32, %c0_i32_0 : i32, i32
  }
  func.func @transform_12(%arg0: i32, %arg1: i32) -> (i32, i32) {
    %c0_i32 = arith.constant 0 : i32
    %c0_i32_0 = arith.constant 0 : i32
    %c0_i32_1 = arith.constant 0 : i32
    return %c0_i32, %c0_i32_0 : i32, i32
  }
  func.func @transform_13(%arg0: i32, %arg1: i32) -> (i32, i32) {
    %c0_i32 = arith.constant 0 : i32
    %c0_i32_0 = arith.constant 0 : i32
    %c0_i32_1 = arith.constant 0 : i32
    return %c0_i32, %c0_i32_0 : i32, i32
  }
  func.func @transform_14(%arg0: i32, %arg1: i32) -> (i32, i32) {
    %c0_i32 = arith.constant 0 : i32
    %c0_i32_0 = arith.constant 0 : i32
    %c0_i32_1 = arith.constant 0 : i32
    return %c0_i32, %c0_i32_0 : i32, i32
  }
  func.func @transform_15(%arg0: i32, %arg1: i32) -> (i32, i32) {
    %c0_i32 = arith.constant 0 : i32
    %c0_i32_0 = arith.constant 0 : i32
    %c0_i32_1 = arith.constant 0 : i32
    return %c0_i32, %c0_i32_0 : i32, i32
  }
  func.func @transform_16(%arg0: i32, %arg1: i32) -> (i32, i32) {
    %c0_i32 = arith.constant 0 : i32
    %c0_i32_0 = arith.constant 0 : i32
    %c0_i32_1 = arith.constant 0 : i32
    return %c0_i32, %c0_i32_0 : i32, i32
  }
  func.func @transform_17(%arg0: i32, %arg1: i32) -> (i32, i32, i32) {
    %c0_i32 = arith.constant 0 : i32
    %c0_i32_0 = arith.constant 0 : i32
    return %arg0, %arg1, %c0_i32 : i32, i32, i32
  }
}

</mosaic_0001>

<bundles_post_ra>
// kernel: tpu_custom_call.1
= control target key start
LH: loop header
LB: loop body
LE: loop exit
PB: predicated region body
PF: predicated region fallthrough
CT: control target
= control target key end

     0   :  { %s2800_s0 = inlined_call_operand.vmem [shape: f32[2,8,32], index: 0, kind: input, shape index: {}]   ;;  %s2801_s1 = inlined_call_operand.vmem [shape: f32[1,32], index: 1, kind: input, shape index: {}]   ;;  %s2802_s2 = inlined_call_operand.vmem [shape: f32[1,32], index: 2, kind: input, shape index: {}]   ;;  %s2803_s3 = inlined_call_operand.vmem [shape: bf16[32,32], index: 3, kind: input, shape index: {}]   ;;  %s2804_s4 = inlined_call_operand.vmem [shape: bf16[32,32], index: 4, kind: input, shape index: {}]   ;;  %s2805_s5 = inlined_call_operand.hbm [shape: bf16[32,32], index: 5, kind: input, shape index: {}]   ;;  %s2806_s6 = inlined_call_operand.vmem [shape: f32[1,32], index: 6, kind: input, shape index: {}]   ;;  %s2807_s7 = inlined_call_operand.vmem [shape: f32[1,32], index: 7, kind: input, shape index: {}]   ;;  %s2808_s8 = inlined_call_operand.vmem [shape: f32[1,32], index: 8, kind: input, shape index: {}]   ;;  %s2809_s9 = inlined_call_operand.hbm [shape: bf16[4,8,32], index: 9, kind: input, shape index: {}]   ;;  %s2810_s10 = inlined_call_operand.vmem [shape: f32[1,32], index: 10, kind: input, shape index: {}]   ;;  %s2811_s11 = inlined_call_operand.vmem [shape: f32[1,32], index: 11, kind: input, shape index: {}]   ;;  %s2812_s12 = inlined_call_operand.vmem [shape: f32[1,32], index: 12, kind: input, shape index: {}]   ;;  %s2813_s13 = inlined_call_operand.hbm [shape: bf16[32,64], index: 13, kind: input, shape index: {}]   ;;  %s2814_s14 = inlined_call_operand.vmem [shape: f32[1,64], index: 14, kind: input, shape index: {}]   ;;  %s2815_s15 = inlined_call_operand.vmem [shape: bf16[64,32], index: 15, kind: input, shape index: {}]   ;;  %s2816_s16 = inlined_call_operand.vmem [shape: f32[1,32], index: 16, kind: input, shape index: {}]   ;;  %s2817_s17 = inlined_call_operand.hbm [shape: f32[2,8,32], index: 17, kind: output, shape index: {}]  }
   0x1   :  { %2825 = sst [smem:[#allocation22_spill]] %s2800_s0 }
   0x2   :  { %2826 = sst [smem:[#allocation23_spill]] %s2801_s1 }
   0x3   :  { %22 = vsyncpa [#allocation6], 0 }
   0x4   :  { %23 = vsyncpa [#allocation9], 0 }
   0x5   :  { %24 = vsyncpa [#allocation7], 0 }
   0x6   :  { %26 = vsyncpa [#allocation7 + $0x1], 0  ;;  %s2452_s24 = smov 0   ;;  %s2454_s25 = smov 0  }
   0x7   :  { %s2456_s26 = smov 0   ;;  %s2458_s27 = smov 0  }
   0x8   :  { %s2460_s28 = smov 0   ;;  %s2462_s29 = smov 0  }
   0x9 LB: > { %2827 = sst [smem:[#allocation15_spill]] %s2329_s24  ;;  %s1843_s0 = sadd.s32 4294967295, %s2349_s29   ;;  %s2349_s29 = sphi %s2462_s29, %s32_s29   ;;  %s2345_s28 = sphi %s2460_s28, %s2848_s28   ;;  %s2341_s27 = sphi %s2458_s27, %s2847_s27   ;;  %s2337_s26 = sphi %s2456_s26, %s2846_s26   ;;  %s2333_s25 = sphi %s2454_s25, %s2850_s25   ;;  %s2329_s24 = sphi %s2452_s24, %s2849_s24  }
   0xa   : > { %2828 = sst [smem:[#allocation16_spill]] %s2337_s26  ;;  %s1844_s30 = sadd.s32 4294967294, %s2349_s29  }
   0xb   : > { %2829 = sst [smem:[#allocation17_spill]] %s2345_s28  ;;  %s44_s18 = sadd.s32 1, %s2345_s28 }
   0xc   : > { %2830 = sst [smem:[#allocation18_spill]] %s2349_s29  ;;  %s415_s19 = sadd.s32 1, %s2337_s26 }
   0xd   : > { %p46_p0 = scmp.ge.s32.totalorder %s44_s18, 2  ;;  %p425_p1 = scmp.ne.s32.totalorder %s2337_s26, %s2333_s25 }
   0xe   : > { %p426_p2 = scmp.eq.s32.totalorder %s1843_s0, 1  ;;  %p431_p3 = scmp.ne.s32.totalorder %s2333_s25, %s2329_s24 }
   0xf   : > { %s2852_s18 = smov (%p46_p0, %s44_s18), 0  ;;  %p432_p5 = scmp.eq.s32.totalorder %s1844_s30, 1 }
  0x10   : > { %2831 = sst [smem:[#allocation19_spill]] %s2852_s18  ;;  %p2492_p4 = por %p426_p2, %p425_p1 }
  0x11   : > { %s410_s20 = ssub.s32 %s2345_s28, %s2852_s18  ;;  %p1845_p6 = scmp.ge.s32.totalorder %s2349_s29, 1 }
  0x12   : > { %p413_p7 = scmp.eq.s32.totalorder %s410_s20, 0  ;;  %p2499_p8 = por %p432_p5, %p431_p3 }
  0x13   : > { %p439_p9 = scmp.lt.s32.totalorder %s2349_s29, 3  ;;  %p2511_p11 = scmp.eq.s32.totalorder %s1843_s0, 0 }
  0x14   : > { %s2833_s21 = scalar_select %p2499_p8, 1, 0 }
  0x15   : > { %s2505_s22 = scalar_select %p413_p7, %s2337_s26, %s415_s19  }
  0x16   : > { %2834 = sst [smem:[#allocation20_spill]] %s2833_s21  ;;  %p2507_p10 = pnand %p1845_p6, %p439_p9 }
  0x17   : > { %2835 = sst [smem:[#allocation21_spill]] %s2505_s22  ;;  %s2351_s30 = smov [#allocation8]  }
  0x18   : > { %p2076_p12 = pneg %p2507_p10  ;;  %s485_s20 = sshll.u32 %s2351_s30, 4  ;;  %s486_s20 = int_to_ptr.vmem [resolvable:$true] %s485_s20 }
  0x19   : > { %s2352_s19 = smov [#allocation5]   ;;  %s2198_s0 = scalar_lea.vmem %s486_s20, 256 }
  0x1a   : > { %p2519_p13 = pnand %p2511_p11, %p2076_p12  ;;  %s463_s28 = sshll.u32 %s2352_s19, 4  ;;  %s464_s28 = int_to_ptr.vmem [resolvable:$true] %s463_s28 }
  0x1b   : > { %p2199_p1 = scmp.ne.s32.totalorder %s486_s20, %s2198_s0  ;;  %p2206_p5 = scmp.lt.s32.totalorder %s486_s20, %s486_s20 }
  0x1c   : > { %p2189_p0 = pneg %p2519_p13  ;;  %p2207_p6 = scmp.lt.s32.totalorder %s2198_s0, %s2198_s0 }
  0x1e   : > { %p2201_p2 = pnand %p2199_p1, %p2189_p0  ;;  %p2208_p7 = por %p2207_p6, %p2206_p5 }
  0x20   : > { %p2202_p3 = pneg %p2201_p2 }
  0x22   : > { %p2209_p9 = pnand %p2208_p7, %p2202_p3 }
  0x24   : > { %2212 = shalt.err (!%p2209_p9)
}
  0x25   : > { %s2353_s30 = smov 64   ;;  %s2354_s22 = smov 4  }
  0x26   : > { %2082 = dma.hbm_to_vmem [thread:$0]  (!%p2519_p13), %s2809_s9, 256, %s486_s20, [#allocation9], %s2353_s30, %s2353_s30, %s2354_s22  }
  0x27   : > { %s2224_s21 = scalar_lea.vmem %s464_s28, 256  ;;  %p2232_p8 = scmp.lt.s32.totalorder %s464_s28, %s464_s28 }
  0x28   : > { %p2225_p12 = scmp.ne.s32.totalorder %s464_s28, %s2224_s21  ;;  %p2233_p5 = scmp.lt.s32.totalorder %s2224_s21, %s2224_s21 }
  0x2a   : > { %p2227_p1 = pnand %p2225_p12, %p2189_p0  ;;  %p2234_p3 = por %p2233_p5, %p2232_p8 }
  0x2c   : > { %p2228_p2 = pneg %p2227_p1 }
  0x2e   : > { %p2235_p6 = pnand %p2234_p3, %p2228_p2 }
  0x30   : > { %2238 = shalt.err (!%p2235_p6)
}
  0x31   : > { %2079 = dma.hbm_to_vmem [thread:$0]  (!%p2519_p13), %s2805_s5, 256, %s464_s28, [#allocation6], %s2353_s30, %s2353_s30, %s2354_s22  }
  0x32   : > { %s2355_s26 = smov [#allocation10]  }
  0x33   : > { %s507_s20 = sshll.u32 %s2355_s26, 4  ;;  %s508_s20 = int_to_ptr.vmem [resolvable:$true] %s507_s20 }
  0x34   : > { %s2250_s19 = scalar_lea.vmem %s508_s20, 256  ;;  %p2258_p1 = scmp.lt.s32.totalorder %s508_s20, %s508_s20 }
  0x35   : > { %p2251_p7 = scmp.ne.s32.totalorder %s508_s20, %s2250_s19  ;;  %p2259_p8 = scmp.lt.s32.totalorder %s2250_s19, %s2250_s19 }
  0x37   : > { %p2253_p9 = pnand %p2251_p7, %p2189_p0  ;;  %p2260_p2 = por %p2259_p8, %p2258_p1 }
  0x39   : > { %p2254_p12 = pneg %p2253_p9 }
  0x3b   : > { %p2261_p5 = pnand %p2260_p2, %p2254_p12 }
  0x3d   : > { %2264 = shalt.err (!%p2261_p5)
}
  0x3e   : > { %2085 = dma.hbm_to_vmem [thread:$0]  (!%p2519_p13), %s2813_s13, 256, %s508_s20, [#allocation9], %s2353_s30, %s2353_s30, %s2354_s22  }
  0x3f   : > { %539 = sbr.rel (%p2507_p10) target bundleno = 2401 (0x961), region = 88 }
  0x44   : > { %2316 = dma.done.wait (%p2511_p11), [#allocation6], 256  }
  0x45   : > { %2318 = vsyncadd (%p2511_p11), [#allocation6], 4294967040 }
  0x46   : > { %2320 = dma.done.wait (%p2511_p11), [#allocation9], 512  }
  0x47   : > { %2322 = vsyncadd (%p2511_p11), [#allocation9], 4294966784  ;;  %p598_p0 = scmp.lt.s32.totalorder %s2341_s27, 1  ;;  %s2839_s30 = sld [smem:[#allocation22_spill]]  ;;  %vm610_vm0 = vcmask 261120   ;;  %v2155_v7 = vld [vmem:[%s2803_s3 + $0x8] sm:$0xff]  }
  0x48   : > { %v2156_v8 = vld [vmem:[#allocation5 + $0x8] sm:$0xff]   ;;  %v2356_v9 = vmov 0.0   ;;  %v2157_v10 = vld [vmem:[%s2803_s3] sm:$0xff]   ;;  %v2158_v11 = vld [vmem:[#allocation5] sm:$0xff]   ;;  %vm2357_vm1 = vmmov 0   ;;  %vm707_vm2 = vcmask 60416  }
  0x49   : > { %s599_s28 = scalar_select %p598_p0, %s2341_s27, 1  ;;  %1946 = vmatprep.subr.bf16.mxu1 %v2356_v9  ;;  %1962 = vmatprep.subr.bf16.mxu0 %v2356_v9  ;;  %v1857_v18 = vld [vmem:[%s2802_s2] ss:$0 sm:$0xff]  ;;  %v2159_v21 = vld [vmem:[%s2804_s4 + $0x8] sm:$0xff]   ;;  %vm908_vm3 = vcmask 64512   ;;  %vm1152_vm4 = vcmask 1043456  }
  0x4a   : > { %1947 = vmatpush3.bf16.msra.mxu1 %v2155_v7  ;;  %1963 = vmatpush3.bf16.msra.mxu0 %v2156_v8  ;;  %v2160_v23 = vld [vmem:[%s2804_s4] sm:$0xff]   ;;  %s2359_s22 = smov 120   ;;  %s2360_s23 = smov 104   ;;  %vm1679_vm5 = vcmask 523264  }
  0x4b   : > { %s1855_s18 = sshll.u32 %s599_s28, 3  ;;  %1948 = vmatprep.subr.bf16.mxu1 %v2356_v9  ;;  %1964 = vmatprep.subr.bf16.mxu0 %v2356_v9  ;;  %s2840_s28 = sld [smem:[#allocation23_spill]]  ;;  %v1858_v24 = vld [vmem:[%s2806_s6] ss:$0 sm:$0xff] }
  0x4c   : > { %1950 = vmatprep.mubr.msk.bf16.mxu1 %vm2357_vm1, %v2356_v9  ;;  %1966 = vmatprep.mubr.msk.bf16.mxu0 %vm2357_vm1, %v2356_v9  ;;  %v1868_v25 = vld [vmem:[%s2808_s8] ss:$0 sm:$0xff]  ;;  %s595_s20 = sand.u32 1, %s2333_s25   ;;  %s2361_s26 = smov [#allocation11]  }
  0x4d   : > { %s601_s0 = scalar_lea.vmem %s2839_s30, %s1855_s18  ;;  %v1863_v38 = vld [vmem:[%s2807_s7] ss:$0 sm:$0xff]  ;;  %s2358_s18 = smov 112  }
  0x4e   : > { %v2564_v0 = vld [vmem:[%s601_s0] sm:$0xff]  ;;  %1949 = vmatpush3.bf16.msra.mxu1 %v2157_v10  ;;  %1965 = vmatpush3.bf16.msra.mxu0 %v2158_v11  ;;  %s1854_s19 = sshll.u32 %s595_s20, 3 }
  0x4f   : > { %v611_v1 = vsel %vm610_vm0, %v2564_v0, 0.0  ;;  %1954 = vmatprep.subr.bf16.mxu1 %v2356_v9  ;;  %1976 = vmatprep.subr.bf16.mxu0 %v2356_v9 }
  0x50   : > { %612 = vadd.xlane.f32.xlu0 %v611_v1 }
  0x51   : > { %v1856_v16 = vld [vmem:[%s2840_s28] ss:$0 sm:$0xff]  ;;  %s1899_s28 = sshll.u32 %s2341_s27, 7  ;;  %s1726_s27 = scalar_lea.sflag [#allocation7], %s595_s20 }
  0x52   : > { %s2753_s0 = scalar_lea.hbm %s2817_s17, %s1899_s28 }
  0xd9   : > { %v613_v2 = vpop.xlane.xlu0 %612 }
  0xda   : > { %v615_v3 = vmul.f32 0.03125, %v613_v2 }
  0xdc   : > { %v616_v4 = vsub.f32 %v2564_v0, %v615_v3 }
  0xde   : > { %v617_v5 = vmul.f32 %v616_v4, %v616_v4 }
  0xe0   : > { %v618_v6 = vsel %vm610_vm0, %v617_v5, 0.0 }
  0xe1   : > { %619 = vadd.xlane.f32.xlu0 %v618_v6 }
 0x16a   : > { %v620_v12 = vpop.xlane.xlu0 %619 }
 0x16b   : > { %v621_v13 = vmul.f32 0.03125, %v620_v12 }
 0x16d   : > { %v622_v14 = vadd.f32 1e-05, %v621_v13 }
 0x16f   : > { %2167 = vrsqrt.f32 %v622_v14 }
 0x17c   : > { %v2168_v15 = vpop.eup %2167 }
 0x17d   : > { %v624_v17 = vmul.f32 %v2168_v15, %v616_v4 }
 0x17f   : > { %v631_v19 = vmul.f32 %v1856_v16, %v624_v17 }
 0x181   : > { %v638_v20 = vadd.f32 %v1857_v18, %v631_v19 }
 0x183   : > { %v639_v22 = vpack.c.bf16 %v638_v20, %v638_v20 }
 0x185   : > { %1951 = vmatmul.mubr.msk.bf16.vlgmr.msra.gmra.mxu1 %vm610_vm0, %v639_v22  ;;  %1967 = vmatmul.mubr.msk.bf16.vlgmr.msra.gmra.mxu0 %vm610_vm0, %v639_v22 }
 0x186   : > { %1955 = vmatpush3.bf16.msra.mxu1 %v2159_v21  ;;  %1958 = vmatprep.mubr.msk.bf16.mxu1 %vm2357_vm1, %v2356_v9 }
 0x187   : > { %1956 = vmatprep.subr.bf16.mxu1 %v2356_v9  ;;  %1978 = vmatprep.mubr.msk.bf16.mxu0 %vm2357_vm1, %v2356_v9 }
 0x18a   : > { %1957 = vmatpush3.bf16.msra.mxu1 %v2160_v23 }
 0x18b   : > { %1970 = vmatprep.subr.bf16.mxu1 %v2356_v9 }
 0x18d   : > { %1959 = vmatmul.mubr.msk.bf16.vlgmr.msra.gmra.mxu1 %vm610_vm0, %v639_v22 }
 0x18e   : > { %1972 = vmatprep.mubr.msk.bf16.mxu1 %vm2357_vm1, %v2356_v9 }
 0x245   : > { %v700_v26 = vpop.f32.mrf.mxu1  ;;  %v867_v27 = vpop.f32.mrf.mxu0 }
 0x246   : > { %v701_v28 = vadd.f32 %v1858_v24, %v700_v26  ;;  %v868_v29 = vadd.f32 %v1868_v25, %v867_v27 }
 0x247   : > { %v1952_v30 = vpop.f32.mrf.mxu1  ;;  %v1968_v31 = vpop.f32.mrf.mxu0 }
 0x248   : > { %v706_v32 = vpack.c.bf16 %v701_v28, %v701_v28  ;;  %v2615_v33 = vpack.c.bf16 %v868_v29, %v868_v29 }
 0x249   : > { %v703_v34 = vpop.f32.mrf.mxu1  ;;  %v870_v35 = vpop.f32.mrf.mxu0 }
 0x24a   : > { %708 = vst.msk [vmem:[#allocation2] sm:$0xf] %vm707_vm2, %v706_v32  ;;  %874 = vst.msk [vmem:[#allocation4] sm:$0xf] %vm707_vm2, %v2615_v33 }
 0x24b   : > { %v1953_v36 = vpop.f32.mrf.mxu1  ;;  %v1969_v37 = vpop.f32.mrf.mxu0 }
 0x24d   : > { %v784_v39 = vpop.f32.mrf.mxu1 }
 0x24e   : > { %v785_v40 = vadd.f32 %v1863_v38, %v784_v39 }
 0x24f   : > { %v1960_v41 = vpop.f32.mrf.mxu1 }
 0x250   : > { %v790_v42 = vpack.c.bf16 %v785_v40, %v785_v40 }
 0x251   : > { %v787_v43 = vpop.f32.mrf.mxu1  ;;  %v900_v47 = vld [vmem:[#allocation2] sm:$0xf] }
 0x252   : > { %791 = vst.msk [vmem:[#allocation3] sm:$0xf] %vm707_vm2, %v790_v42  ;;  %800 = vrot.lane.b32.xlu0 %v790_v42, %s2358_s18  ;;  %795 = vrot.lane.b32.xlu1 %v790_v42, %s2359_s22  ;;  %v1145_v61 = vld [vmem:[#allocation4] sm:$0xf] }
 0x253   : > { %v1961_v44 = vpop.f32.mrf.mxu1  ;;  %v1154_v63 = vsel %vm1152_vm4, %v1145_v61, 0 }
 0x256   : > { %712 = vrot.lane.b32.xlu1 %v706_v32, %s2359_s22 }
 0x259   : > { %v904_v45 = vld [vmem:[#allocation3] sm:$0xf] }
 0x25a   : > { %805 = vrot.lane.b32.xlu1 %v790_v42, %s2360_s23  ;;  %v913_v46 = vsel %vm908_vm3, %v904_v45, 0 }
 0x25b   : > { %1971 = vmatpush3.bf16.xpose.msra.mxu1 %v913_v46 }
 0x25c   : > { %1982 = vmatprep.subr.bf16.mxu1 %v2356_v9 }
 0x25e   : > { %717 = vrot.lane.b32.xlu1 %v706_v32, %s2358_s18 }
 0x262   : > { %722 = vrot.lane.b32.xlu1 %v706_v32, %s2360_s23  ;;  %1973 = vmatmul.mubr.msk.bf16.vlgmr.msra.gmra.mxu1 %vm908_vm3, %v900_v47 }
 0x263   : > { %1984 = vmatprep.mubr.msk.bf16.mxu1 %vm2357_vm1, %v2356_v9 }
 0x2c4   : > { %v801_v48 = vpop.permute.xlu0 %800  ;;  %v796_v49 = vpop.permute.xlu1 %795 }
 0x2c5   : > { %804 = vst.msk [vmem:[#allocation3 + $0x8] sm:$0xf] %vm707_vm2, %v801_v48  ;;  %799 = vst.msk [vmem:[#allocation3 + $0x4] sm:$0xf] %vm707_vm2, %v796_v49 }
 0x2c8   : > { %v713_v50 = vpop.permute.xlu1 %712 }
 0x2c9   : > { %716 = vst.msk [vmem:[#allocation2 + $0x4] sm:$0xf] %vm707_vm2, %v713_v50 }
 0x2cc   : > { %v806_v51 = vpop.permute.xlu1 %805  ;;  %v905_v52 = vld [vmem:[#allocation3 + $0x4] sm:$0xf]  ;;  %v906_v53 = vld [vmem:[#allocation3 + $0x8] sm:$0xf] }
 0x2cd   : > { %809 = vst.msk [vmem:[#allocation3 + $0xc] sm:$0xf] %vm707_vm2, %v806_v51  ;;  %v959_v54 = vsel %vm908_vm3, %v905_v52, 0  ;;  %v1005_v55 = vsel %vm908_vm3, %v906_v53, 0 }
 0x2ce   : > { %1977 = vmatpush3.bf16.xpose.msra.mxu0 %v959_v54  ;;  %1983 = vmatpush3.bf16.xpose.msra.mxu1 %v1005_v55 }
 0x2cf   : > { %1988 = vmatprep.subr.bf16.mxu0 %v2356_v9  ;;  %1994 = vmatprep.subr.bf16.mxu1 %v2356_v9 }
 0x2d0   : > { %v718_v56 = vpop.permute.xlu1 %717  ;;  %v901_v58 = vld [vmem:[#allocation2 + $0x4] sm:$0xf] }
 0x2d1   : > { %721 = vst.msk [vmem:[#allocation2 + $0x8] sm:$0xf] %vm707_vm2, %v718_v56 }
 0x2d4   : > { %v723_v57 = vpop.permute.xlu1 %722  ;;  %v907_v59 = vld [vmem:[#allocation3 + $0xc] sm:$0xf] }
 0x2d5   : > { %726 = vst.msk [vmem:[#allocation2 + $0xc] sm:$0xf] %vm707_vm2, %v723_v57  ;;  %1979 = vmatmul.mubr.msk.bf16.vlgmr.msra.gmra.mxu0 %vm908_vm3, %v901_v58  ;;  %v1051_v60 = vsel %vm908_vm3, %v907_v59, 0 }
 0x2d6   : > { %1989 = vmatpush3.bf16.xpose.msra.mxu0 %v1051_v60  ;;  %1990 = vmatprep.mubr.msk.bf16.mxu0 %vm2357_vm1, %v2356_v9 }
 0x2d7   : > { %2000 = vmatprep.subr.bf16.mxu0 %v2356_v9 }
 0x2d8   : > { %v902_v62 = vld [vmem:[#allocation2 + $0x8] sm:$0xf] }
 0x2d9   : > { %1985 = vmatmul.mubr.msk.bf16.vlgmr.msra.gmra.mxu1 %vm908_vm3, %v902_v62 }
 0x2da   : > { %1995 = vmatpush3.bf16.msra.mxu1 %v1154_v63  ;;  %1996 = vmatprep.mubr.msk.bf16.mxu1 %vm2357_vm1, %v2356_v9 }
 0x2db   : > { %2006 = vmatprep.subr.bf16.mxu1 %v2356_v9 }
 0x2dc   : > { %v903_v1 = vld [vmem:[#allocation2 + $0xc] sm:$0xf] }
 0x2dd   : > { %1991 = vmatmul.mubr.msk.bf16.vlgmr.msra.gmra.mxu0 %vm908_vm3, %v903_v1 }
 0x2de   : > { %2002 = vmatprep.mubr.msk.bf16.mxu0 %vm2357_vm1, %v2356_v9 }
 0x322   : > { %v949_v2 = vpop.f32.mrf.mxu1 }
 0x323   : > { %v1093_v3 = vmul.f32 0.35355338, %v949_v2 }
 0x324   : > { %v1974_v4 = vpop.f32.mrf.mxu1 }
 0x325   : > { %v1097_v5 = vsel %vm908_vm3, %v1093_v3, -inf }
 0x326   : > { %1098 = vmax.xlane.f32.xlu1 %v1097_v5  ;;  %v952_v6 = vpop.f32.mrf.mxu1 }
 0x328   : > { %v1975_v7 = vpop.f32.mrf.mxu1 }
 0x329   : > { %v1335_v7 = vld [vmem:[#allocation8] sm:$0xf] }
 0x395   : > { %v995_v8 = vpop.f32.mrf.mxu0 }
 0x396   : > { %v1094_v10 = vmul.f32 0.35355338, %v995_v8 }
 0x397   : > { %v1980_v11 = vpop.f32.mrf.mxu0 }
 0x398   : > { %v1100_v12 = vsel %vm908_vm3, %v1094_v10, -inf  ;;  %v1389_v11 = vsel %vm1152_vm4, %v1335_v7, 0 }
 0x399   : > { %1101 = vmax.xlane.f32.xlu0 %v1100_v12  ;;  %v998_v13 = vpop.f32.mrf.mxu0  ;;  %v1041_v14 = vpop.f32.mrf.mxu1  ;;  %v1338_v12 = vld [vmem:[#allocation8 + $0x4] sm:$0xf] }
 0x39a   : > { %v1095_v15 = vmul.f32 0.35355338, %v1041_v14  ;;  %v1343_v13 = vsel %vm1152_vm4, %v1338_v12, 0 }
 0x39b   : > { %v1981_v16 = vpop.f32.mrf.mxu0  ;;  %v1986_v17 = vpop.f32.mrf.mxu1 }
 0x39c   : > { %v1103_v18 = vsel %vm908_vm3, %v1095_v15, -inf }
 0x39d   : > { %v1087_v19 = vpop.f32.mrf.mxu0  ;;  %1104 = vmax.xlane.f32.xlu1 %v1103_v18  ;;  %v1044_v20 = vpop.f32.mrf.mxu1 }
 0x39e   : > { %v1096_v21 = vmul.f32 0.35355338, %v1087_v19 }
 0x39f   : > { %v1987_v22 = vpop.f32.mrf.mxu1  ;;  %v1992_v23 = vpop.f32.mrf.mxu0 }
 0x3a0   : > { %v1106_v24 = vsel %vm908_vm3, %v1096_v21, -inf }
 0x3a1   : > { %v1090_v25 = vpop.f32.mrf.mxu0  ;;  %1107 = vmax.xlane.f32.xlu1 %v1106_v24 }
 0x3a3   : > { %v1993_v26 = vpop.f32.mrf.mxu0 }
 0x3af   : > { %v1099_v27 = vpop.xlane.xlu1 %1098 }
 0x3b0   : > { %v1109_v28 = vsub.f32 %v1093_v3, %v1099_v27 }
 0x3b2   : > { %v1113_v29 = vmul.f32 1.442695, %v1109_v28 }
 0x3b4   : > { %2169 = vpow2.f32 %v1113_v29 }
 0x3c1   : > { %v2170_v30 = vpop.eup %2169 }
 0x3c2   : > { %v1121_v31 = vsel %vm908_vm3, %v2170_v30, 0.0 }
 0x3c3   : > { %1122 = vadd.xlane.f32.xlu0 %v1121_v31 }
 0x422   : > { %v1102_v32 = vpop.xlane.xlu0 %1101 }
 0x423   : > { %v1110_v34 = vsub.f32 %v1094_v10, %v1102_v32 }
 0x425   : > { %v1115_v35 = vmul.f32 1.442695, %v1110_v34 }
 0x426   : > { %v1105_v36 = vpop.xlane.xlu1 %1104 }
 0x427   : > { %2171 = vpow2.f32 %v1115_v35  ;;  %v1111_v37 = vsub.f32 %v1095_v15, %v1105_v36  ;;  %v1483_v15 = vld [vmem:[#allocation8 + $0xc] sm:$0xf] }
 0x428   : > { %v1488_v17 = vsel %vm1152_vm4, %v1483_v15, 0 }
 0x429   : > { %v1117_v38 = vmul.f32 1.442695, %v1111_v37 }
 0x42a   : > { %v1108_v44 = vpop.xlane.xlu1 %1107 }
 0x42b   : > { %2173 = vpow2.f32 %v1117_v38  ;;  %v1112_v45 = vsub.f32 %v1096_v21, %v1108_v44  ;;  %v1433_v21 = vld [vmem:[#allocation8 + $0x8] sm:$0xf] }
 0x42c   : > { %v1438_v24 = vsel %vm1152_vm4, %v1433_v21, 0 }
 0x42d   : > { %v1119_v46 = vmul.f32 1.442695, %v1112_v45 }
 0x434   : > { %v2172_v39 = vpop.eup %2171 }
 0x435   : > { %v1124_v40 = vsel %vm908_vm3, %v2172_v39, 0.0 }
 0x436   : > { %1125 = vadd.xlane.f32.xlu1 %v1124_v40 }
 0x438   : > { %v2174_v41 = vpop.eup %2173 }
 0x439   : > { %v1127_v42 = vsel %vm908_vm3, %v2174_v41, 0.0 }
 0x43a   : > { %1128 = vadd.xlane.f32.xlu0 %v1127_v42 }
 0x447   : > { %883 = vrot.lane.b32.xlu1 %v2615_v33, %s2358_s18  ;;  %s597_s18 = scalar_lea.vmem [#allocation11], %s1854_s19  ;;  %s2269_s19 = sshll.u32 %s2361_s26, 4  ;;  %s2270_s19 = int_to_ptr.vmem [resolvable:$false] %s2269_s19 }
 0x448   : > { %s2271_s21 = scalar_lea.vmem %s2270_s19, 256 }
 0x44c   : > { %v1123_v43 = vpop.xlane.xlu0 %1122 }
 0x44d   : > { %2175 = vrcp.f32 %v1123_v43 }
 0x44e   : > { %2177 = vpow2.f32 %v1119_v46 }
 0x450   : > { %878 = vrot.lane.b32.xlu0 %v2615_v33, %s2359_s22  ;;  %s1740_s22 = sshll.u32 %s597_s18, 4  ;;  %s2755_s22 = int_to_ptr.vmem [resolvable:$true] %s1740_s22 }
 0x451   : > { %s2265_s24 = scalar_lea.vmem %s2755_s22, 128  ;;  %p2272_p3 = scmp.lt.s32.totalorder %s2755_s22, %s2270_s19 }
 0x452   : > { %p2266_p10 = scmp.ne.s32.totalorder %s2755_s22, %s2265_s24  ;;  %p2273_p6 = scmp.lt.s32.totalorder %s2271_s21, %s2265_s24 }
 0x454   : > { %p2267_p11 = pnand %p2266_p10, %p2492_p4  ;;  %p2274_p7 = por %p2273_p6, %p2272_p3 }
 0x456   : > { %p2268_p13 = pneg %p2267_p11 }
 0x458   : > { %p2275_p9 = pnand %p2274_p7, %p2268_p13 }
 0x45a   : > { %v2176_v47 = vpop.eup %2175 }
 0x45b   : > { %v1137_v48 = vmul.f32 %v2176_v47, %v2170_v30  ;;  %v2178_v50 = vpop.eup %2177 }
 0x45c   : > { %v1130_v51 = vsel %vm908_vm3, %v2178_v50, 0.0 }
 0x45d   : > { %v1141_v49 = vpack.c.bf16 %v1137_v48, %v1137_v48 }
 0x45f   : > { %1997 = vmatmul.mubr.msk.bf16.vlgmr.msra.gmra.mxu1 %vm908_vm3, %v1141_v49 }
 0x460   : > { %2008 = vmatprep.mubr.msk.bf16.mxu1 %vm2357_vm1, %v2356_v9 }
 0x46b   : > { %1131 = vadd.xlane.f32.xlu1 %v1130_v51 }
 0x47c   : > { %888 = vrot.lane.b32.xlu1 %v2615_v33, %s2360_s23 }
 0x4bf   : > { %v1126_v52 = vpop.xlane.xlu1 %1125 }
 0x4c0   : > { %2179 = vrcp.f32 %v1126_v52 }
 0x4c3   : > { %v1129_v53 = vpop.xlane.xlu0 %1128  ;;  %v884_v54 = vpop.permute.xlu1 %883 }
 0x4c4   : > { %2181 = vrcp.f32 %v1129_v53  ;;  %887 = vst.msk [vmem:[#allocation4 + $0x8] sm:$0xf] %vm707_vm2, %v884_v54  ;;  %v1885_v54 = vld [vmem:[%s2810_s10] ss:$0 sm:$0xff] }
 0x4c7   : > { %v879_v55 = vpop.permute.xlu0 %878 }
 0x4c8   : > { %882 = vst.msk [vmem:[#allocation4 + $0x4] sm:$0xf] %vm707_vm2, %v879_v55 }
 0x4cb   : > { %v1147_v56 = vld [vmem:[#allocation4 + $0x8] sm:$0xf] }
 0x4cc   : > { %v1246_v57 = vsel %vm1152_vm4, %v1147_v56, 0 }
 0x4cd   : > { %v2180_v58 = vpop.eup %2179  ;;  %2007 = vmatpush3.bf16.msra.mxu1 %v1246_v57 }
 0x4ce   : > { %v1138_v59 = vmul.f32 %v2180_v58, %v2172_v39  ;;  %2018 = vmatprep.subr.bf16.mxu1 %v2356_v9 }
 0x4cf   : > { %v1146_v60 = vld [vmem:[#allocation4 + $0x4] sm:$0xf] }
 0x4d0   : > { %v1200_v33 = vsel %vm1152_vm4, %v1146_v60, 0  ;;  %v1142_v62 = vpack.c.bf16 %v1138_v59, %v1138_v59 }
 0x4d1   : > { %v2182_v61 = vpop.eup %2181  ;;  %2001 = vmatpush3.bf16.msra.mxu0 %v1200_v33 }
 0x4d2   : > { %v1139_v63 = vmul.f32 %v2182_v61, %v2174_v41  ;;  %2012 = vmatprep.subr.bf16.mxu0 %v2356_v9 }
 0x4d4   : > { %2003 = vmatmul.mubr.msk.bf16.vlgmr.msra.gmra.mxu0 %vm908_vm3, %v1142_v62  ;;  %v1143_v1 = vpack.c.bf16 %v1139_v63, %v1139_v63 }
 0x4d5   : > { %2014 = vmatprep.mubr.msk.bf16.mxu0 %vm2357_vm1, %v2356_v9 }
 0x4d6   : > { %2009 = vmatmul.mubr.msk.bf16.vlgmr.msra.gmra.mxu1 %vm908_vm3, %v1143_v1 }
 0x4d7   : > { %2020 = vmatprep.mubr.msk.bf16.mxu1 %vm2357_vm1, %v2356_v9  ;;  %2019 = vmatpush3.bf16.msra.mxu1 %v1343_v13  ;;  %v1887_v13 = vld [vmem:[%s2812_s12] ss:$0 sm:$0xff] }
 0x4d8   : > { %2030 = vmatprep.subr.bf16.mxu1 %v2356_v9 }
 0x4f4   : > { %v1132_v2 = vpop.xlane.xlu1 %1131 }
 0x4f5   : > { %2183 = vrcp.f32 %v1132_v2 }
 0x4f8   : > { %v889_v3 = vpop.permute.xlu1 %888 }
 0x4f9   : > { %892 = vst.msk [vmem:[#allocation4 + $0xc] sm:$0xf] %vm707_vm2, %v889_v3  ;;  %v2161_v3 = vld [vmem:[#allocation10 + $0x8] sm:$0xff]  }
 0x500   : > { %v1148_v4 = vld [vmem:[#allocation4 + $0xc] sm:$0xf] }
 0x501   : > { %v1292_v5 = vsel %vm1152_vm4, %v1148_v4, 0  ;;  %v2162_v4 = vld [vmem:[#allocation10] sm:$0xff]  }
 0x502   : > { %v2184_v6 = vpop.eup %2183  ;;  %2013 = vmatpush3.bf16.msra.mxu0 %v1292_v5  ;;  %v2164_v5 = vld [vmem:[%s2815_s15 + $0x10] sm:$0xff]  }
 0x503   : > { %v1140_v8 = vmul.f32 %v2184_v6, %v2178_v50  ;;  %2024 = vmatprep.subr.bf16.mxu0 %v2356_v9 }
 0x505   : > { %v1144_v10 = vpack.c.bf16 %v1140_v8, %v1140_v8 }
 0x507   : > { %2015 = vmatmul.mubr.msk.bf16.vlgmr.msra.gmra.mxu0 %vm908_vm3, %v1144_v10 }
 0x508   : > { %2025 = vmatpush3.bf16.msra.mxu0 %v1389_v11  ;;  %2026 = vmatprep.mubr.msk.bf16.mxu0 %vm2357_vm1, %v2356_v9  ;;  %v1886_v11 = vld [vmem:[%s2811_s11] ss:$0 sm:$0xff] }
 0x509   : > { %2036 = vmatprep.subr.bf16.mxu0 %v2356_v9 }
 0x51f   : > { %v1190_v14 = vpop.f32.mrf.mxu1 }
 0x520   : > { %v1334_v16 = vpack.c.bf16 %v1190_v14, %v1190_v14 }
 0x521   : > { %v1998_v18 = vpop.f32.mrf.mxu1 }
 0x522   : > { %2027 = vmatmul.mubr.msk.bf16.vlgmr.msra.gmra.mxu0 %vm908_vm3, %v1334_v16  ;;  %v2166_v18 = vld [vmem:[%s2815_s15] sm:$0xff]  }
 0x523   : > { %v1193_v19 = vpop.f32.mrf.mxu1  ;;  %2037 = vmatpush3.bf16.msra.mxu0 %v1488_v17  ;;  %2038 = vmatprep.mubr.msk.bf16.mxu0 %vm2357_vm1, %v2356_v9  ;;  %v2165_v17 = vld [vmem:[%s2815_s15 + $0x8] sm:$0xff]  }
 0x524   : > { %2050 = vmatprep.subr.bf16.mxu0 %v2356_v9  ;;  %v1888_v19 = vld [vmem:[%s2814_s14] ss:$0 sm:$0xff] }
 0x525   : > { %v1999_v20 = vpop.f32.mrf.mxu1 }
 0x594   : > { %v1236_v22 = vpop.f32.mrf.mxu0 }
 0x595   : > { %v1336_v23 = vpack.c.bf16 %v1236_v22, %v1236_v22 }
 0x596   : > { %v2004_v25 = vpop.f32.mrf.mxu0  ;;  %v1282_v26 = vpop.f32.mrf.mxu1 }
 0x597   : > { %2021 = vmatmul.mubr.msk.bf16.vlgmr.msra.gmra.mxu1 %vm908_vm3, %v1336_v23  ;;  %v1431_v32 = vpack.c.bf16 %v1282_v26, %v1282_v26 }
 0x598   : > { %v1239_v27 = vpop.f32.mrf.mxu0  ;;  %v2010_v28 = vpop.f32.mrf.mxu1  ;;  %2031 = vmatpush3.bf16.msra.mxu1 %v1438_v24  ;;  %2032 = vmatprep.mubr.msk.bf16.mxu1 %vm2357_vm1, %v2356_v9 }
 0x599   : > { %2042 = vmatprep.subr.bf16.mxu1 %v2356_v9 }
 0x59a   : > { %v2005_v29 = vpop.f32.mrf.mxu0  ;;  %v1285_v30 = vpop.f32.mrf.mxu1 }
 0x59c   : > { %v2011_v31 = vpop.f32.mrf.mxu1 }
 0x59f   : > { %2033 = vmatmul.mubr.msk.bf16.vlgmr.msra.gmra.mxu1 %vm908_vm3, %v1431_v32 }
 0x5a0   : > { %2046 = vmatprep.mubr.msk.bf16.mxu1 %vm2357_vm1, %v2356_v9  ;;  %2043 = vmatpush3.bf16.msra.mxu1 %v2161_v3 }
 0x5a1   : > { %2044 = vmatprep.subr.bf16.mxu1 %v2356_v9 }
 0x5a4   : > { %2045 = vmatpush3.bf16.msra.mxu1 %v2162_v4 }
 0x5c7   : > { %v1328_v34 = vpop.f32.mrf.mxu0 }
 0x5c8   : > { %v1481_v35 = vpack.c.bf16 %v1328_v34, %v1328_v34 }
 0x5c9   : > { %v2016_v36 = vpop.f32.mrf.mxu0 }
 0x5ca   : > { %2039 = vmatmul.mubr.msk.bf16.vlgmr.msra.gmra.mxu0 %vm908_vm3, %v1481_v35 }
 0x5cb   : > { %v1331_v37 = vpop.f32.mrf.mxu0  ;;  %2058 = vmatprep.mubr.msk.bf16.mxu0 %vm2357_vm1, %v2356_v9 }
 0x5cd   : > { %v2017_v38 = vpop.f32.mrf.mxu0 }
 0x5e2   : > { %v1425_v39 = vpop.f32.mrf.mxu0 }
 0x5e4   : > { %v2028_v40 = vpop.f32.mrf.mxu0 }
 0x5e6   : > { %v1428_v41 = vpop.f32.mrf.mxu0 }
 0x5e8   : > { %v2029_v42 = vpop.f32.mrf.mxu0 }
 0x657   : > { %v1379_v43 = vpop.f32.mrf.mxu1 }
 0x658   : > { %v1426_v51 = vadd.f32 %v1425_v39, %v1379_v43 }
 0x659   : > { %v2022_v44 = vpop.f32.mrf.mxu1 }
 0x65b   : > { %v1382_v45 = vpop.f32.mrf.mxu1 }
 0x65d   : > { %v2023_v46 = vpop.f32.mrf.mxu1 }
 0x65f   : > { %v1474_v47 = vpop.f32.mrf.mxu1 }
 0x660   : > { %v1480_v52 = vadd.f32 %v1474_v47, %v1426_v51 }
 0x661   : > { %v2034_v48 = vpop.f32.mrf.mxu1 }
 0x663   : > { %v1477_v49 = vpop.f32.mrf.mxu1 }
 0x665   : > { %v2035_v50 = vpop.f32.mrf.mxu1 }
 0x68a   : > { %v1524_v53 = vpop.f32.mrf.mxu0 }
 0x68b   : > { %v1530_v55 = vadd.f32 %v1524_v53, %v1480_v52 }
 0x68c   : > { %v2040_v56 = vpop.f32.mrf.mxu0 }
 0x68d   : > { %v1538_v57 = vadd.f32 %v1885_v54, %v1530_v55 }
 0x68e   : > { %v1527_v58 = vpop.f32.mrf.mxu0 }
 0x68f   : > { %v1539_v59 = vadd.f32 %v1538_v57, %v2564_v0  ;;  %v2163_v0 = vld [vmem:[%s2815_s15 + $0x18] sm:$0xff]  }
 0x690   : > { %v2041_v60 = vpop.f32.mrf.mxu0  ;;  %2051 = vmatpush3.bf16.msra.mxu0 %v2163_v0 }
 0x691   : > { %v1543_v33 = vsel %vm610_vm0, %v1539_v59, 0.0  ;;  %2052 = vmatprep.subr.bf16.mxu0 %v2356_v9 }
 0x692   : > { %1544 = vadd.xlane.f32.xlu0 %v1543_v33 }
 0x694   : > { %2053 = vmatpush3.bf16.msra.mxu0 %v2164_v5 }
 0x695   : > { %2054 = vmatprep.subr.bf16.mxu0 %v2356_v9 }
 0x698   : > { %2055 = vmatpush3.bf16.msra.mxu0 %v2165_v17 }
 0x699   : > { %2056 = vmatprep.subr.bf16.mxu0 %v2356_v9  ;;  %v1892_v9 = vld [vmem:[%s2816_s16] ss:$0 sm:$0xff] }
 0x69c   : > { %2057 = vmatpush3.bf16.msra.mxu0 %v2166_v18 }
 0x71b   : > { %v1545_v61 = vpop.xlane.xlu0 %1544 }
 0x71c   : > { %v1547_v62 = vmul.f32 0.03125, %v1545_v61 }
 0x71e   : > { %v1548_v63 = vsub.f32 %v1539_v59, %v1547_v62 }
 0x720   : > { %v1549_v1 = vmul.f32 %v1548_v63, %v1548_v63 }
 0x722   : > { %v1550_v2 = vsel %vm610_vm0, %v1549_v1, 0.0 }
 0x723   : > { %1551 = vadd.xlane.f32.xlu1 %v1550_v2 }
 0x7ac   : > { %v1552_v6 = vpop.xlane.xlu1 %1551 }
 0x7ad   : > { %v1553_v7 = vmul.f32 0.03125, %v1552_v6 }
 0x7af   : > { %v1554_v8 = vadd.f32 1e-05, %v1553_v7 }
 0x7b1   : > { %2185 = vrsqrt.f32 %v1554_v8 }
 0x7be   : > { %v2186_v10 = vpop.eup %2185 }
 0x7bf   : > { %v1556_v12 = vmul.f32 %v2186_v10, %v1548_v63 }
 0x7c1   : > { %v1563_v14 = vmul.f32 %v1886_v11, %v1556_v12 }
 0x7c3   : > { %v1570_v15 = vadd.f32 %v1887_v13, %v1563_v14 }
 0x7c5   : > { %v1571_v16 = vpack.c.bf16 %v1570_v15, %v1570_v15 }
 0x7c7   : > { %2047 = vmatmul.mubr.msk.bf16.vlgmr.msra.gmra.mxu1 %vm610_vm0, %v1571_v16 }
 0x887   : > { %v1632_v20 = vpop.f32.mrf.mxu1 }
 0x888   : > { %v1633_v21 = vadd.f32 %v1888_v19, %v1632_v20 }
 0x889   : > { %v2048_v22 = vpop.f32.mrf.mxu1 }
 0x88a   : > { %v1638_v23 = vmax.f32 %v1633_v21, 0.0 }
 0x88b   : > { %v1635_v24 = vpop.f32.mrf.mxu1 }
 0x88c   : > { %v1639_v25 = vpack.c.bf16 %v1638_v23, %v1638_v23 }
 0x88d   : > { %v2049_v26 = vpop.f32.mrf.mxu1 }
 0x88e   : > { %2059 = vmatmul.mubr.msk.bf16.vlgmr.msra.gmra.mxu0 %vm1679_vm5, %v1639_v25 }
 0x94e   : > { %v1717_v27 = vpop.f32.mrf.mxu0 }
 0x94f   : > { %v1718_v28 = vadd.f32 %v1892_v9, %v1717_v27 }
 0x950   : > { %v2060_v29 = vpop.f32.mrf.mxu0 }
 0x951   : > { %v1723_v30 = vadd.f32 %v1718_v28, %v1539_v59 }
 0x952   : > { %v1720_v31 = vpop.f32.mrf.mxu0 }
 0x953   : > { %1724 = vst.msk [vmem:[%s597_s18] sm:$0xff] %vm610_vm0, %v1723_v30 }
 0x954   : > { %v2061_v32 = vpop.f32.mrf.mxu0 }
 0x955   : > { %2278 = shalt.err (!%p2275_p9)
}
 0x956   : > { %s2279_s29 = scalar_lea.hbm %s2753_s0, 128  ;;  %s2283_s18 = scalar_lea.hbm %s2817_s17, 256 }
 0x957   : > { %p2280_p12 = scmp.ne.s32.totalorder %s2753_s0, %s2279_s29  ;;  %p2284_p2 = scmp.lt.s32.totalorder %s2753_s0, %s2817_s17 }
 0x958   : > { %p2285_p5 = scmp.lt.s32.totalorder %s2283_s18, %s2279_s29 }
 0x959   : > { %p2281_p1 = pnand %p2280_p12, %p2492_p4 }
 0x95a   : > { %p2286_p0 = por %p2285_p5, %p2284_p2 }
 0x95b   : > { %p2282_p8 = pneg %p2281_p1 }
 0x95d   : > { %p2287_p10 = pnand %p2286_p0, %p2282_p8 }
 0x95f   : > { %2290 = shalt.err (!%p2287_p10)
}
 0x960   : > { %2074 = dma.vmem_to_hbm [thread:$0]  (%p2492_p4), %s2755_s22, 128, %s2753_s0, %s1726_s27  }
 0x961 PF: > { %s2841_s24 = sld [smem:[#allocation18_spill]] }
 0x962   : > { %s2842_s26 = sld [smem:[#allocation15_spill]] }
 0x963   : > { %s2843_s19 = sld [smem:[#allocation20_spill]] }
 0x967   : > { %p2096_p11 = scmp.ge.s32.totalorder %s2841_s24, 2 }
 0x968   : > { %s1752_s21 = sand.u32 1, %s2842_s26  }
 0x969   : > { %p2844_p13 = scmp.ne.s32.totalorder %s2843_s19, 0  ;;  %s1753_s20 = scalar_lea.sflag [#allocation7], %s1752_s21 }
 0x96b   : > { %p2087_p3 = pnand %p2096_p11, %p2844_p13 }
 0x96d   : > { %p2088_p6 = pneg %p2087_p3 }
 0x96f   : > { %2324 = dma.done.wait (%p2088_p6), %s1753_s20, 128  }
 0x970   : > { %2326 = vsyncadd (%p2088_p6), %s1753_s20, 4294967168  ;;  %s32_s29 = sadd.s32 1, %s2841_s24   ;;  %s2845_s1 = sld [smem:[#allocation16_spill]] }
 0x971   : > { %p29_p7 = scmp.ge.s32.totalorder %s32_s29, 4   ;;  %s2846_s26 = sld [smem:[#allocation21_spill]] }
 0x972   : > { %s2847_s27 = sld [smem:[#allocation17_spill]]  ;;  %s2849_s24 = smov %s2333_s25 }
 0x973   : > { %s2848_s28 = sld [smem:[#allocation19_spill]]  ;;  %31 = sbr.rel (!%p29_p7) target bundleno = 9 (0x9), region = 154 }
 0x976   : > { %s2850_s25 = smov %s2845_s1 }
 0x978   :  { %1758 = vsyncpa [#allocation6], 1 }
 0x979   :  { %1760 = vsyncpa [#allocation6 + $0x1], 1 }
 0x97a   :  { %1761 = vsyncpa [#allocation9], 1 }
 0x97b   :  { %1762 = vsyncpa [#allocation7], 1 }
 0x97c   :  { %1764 = vsyncpa [#allocation7 + $0x1], 1 }

</bundles_post_ra>
